<compile_context>
chip_gen: v6e
topology: v6e:2x2x1
jax: 0.10.0
libtpu: 0.0.40
codegen_flags: <defaults>
</compile_context>

<pallas_src>
import jax
import jax.numpy as jnp
import numpy as np
from jax import lax
from jax.experimental import pallas as pl
from jax.experimental.pallas import tpu as pltpu


def _round_up(v, m):
    return (v + m - 1) // m * m


def _make_unet_block_kernel(*, W, Nb, eps, skip_scale, conv_dtype):
    # Tap order: dy outer, dx inner -> t = (dy+1)*3 + (dx+1) (matches host weight pack).
    shifts = tuple(dy * W + dx for dy in (-1, 0, 1) for dx in (-1, 0, 1))
    f32 = jnp.float32

    def silu(v):
        return v * jax.nn.sigmoid(v)

    def kernel(x_ref, emb_ref, mask_ref, sel_ref, selt_ref,
               m0_ref, g0w_ref, g0b_ref, w0_ref, b0_ref,
               awsc_ref, absc_ref, awsh_ref, absh_ref,
               m1_ref, g1w_ref, g1b_ref, w1_ref, b1_ref,
               o_ref):
        x = x_ref[...]                        # (Cp, Nb)  lane-dense activations
        sel = sel_ref[...]                    # (Nb, B)   lane -> image one-hot
        selt = selt_ref[...]                  # (B, Nb)   image -> lane broadcast

        def dot32(a, b):
            return jnp.dot(a, b, preferred_element_type=f32)

        def gn_stats(v, m):
            # Per-image GroupNorm statistics, no per-batch Python loop: lane-segment
            # sums, group averaging and the broadcast back to lanes are matmuls.
            mu = dot32(m, dot32(v, sel))                    # (Cp, B) group mean/channel
            d = v - dot32(mu, selt)                         # centered, (Cp, Nb)
            var = dot32(m, dot32(d * d, sel))               # (Cp, B)
            rstd = lax.rsqrt(var + eps)                     # EUP slot
            return d, rstd

        def conv3x3(h, w_ref, b_ref):
            # 3x3 conv (padding=1) as ONE im2col dot: nine border-masked lane
            # rotations (XLU) stacked on sublanes, single MXU matmul, f32 acc.
            taps = []
            for t, s in enumerate(shifts):
                if s == 0:
                    taps.append(h)                          # center tap, mask == 1
                else:
                    r = pltpu.roll(h, shift=(-s) % Nb, axis=1)
                    taps.append(r * mask_ref[t:t + 1, :])
            stacked = jnp.concatenate(taps, axis=0)         # (9*Cp, Nb), tile aligned
            return dot32(w_ref[...], stacked.astype(conv_dtype)) + b_ref[...]

        # ---- norm0 -> SiLU --------------------------------------------------
        d0, rstd0 = gn_stats(x, m0_ref[...])
        gain0 = rstd0 * g0w_ref[...]                        # (Cp, B)
        h = silu(d0 * dot32(gain0, selt) + g0b_ref[...])

        # ---- conv0 (3x3, padding=1) ------------------------------------------
        a0 = conv3x3(h, w0_ref, b0_ref)                     # (Cp, Nb)

        # ---- affine(emb): per-(channel, image) scale & shift ------------------
        emb = emb_ref[...]                                  # (E, B)
        scale = dot32(awsc_ref[...], emb) + absc_ref[...]   # (Cp, B)
        shift = dot32(awsh_ref[...], emb) + absh_ref[...]   # (Cp, B)

        # ---- norm1 -> adaptive scale/shift -> SiLU ----------------------------
        d1, rstd1 = gn_stats(a0, m1_ref[...])
        sp1 = scale + 1.0
        gain1 = rstd1 * g1w_ref[...] * sp1                  # GN affine folded w/ scale
        bias1 = g1b_ref[...] * sp1 + shift
        h1 = silu(d1 * dot32(gain1, selt) + dot32(bias1, selt))

        # dropout(p=0, eval) is the identity.
        # TODO(synk): dropout with p > 0 (training) would need pltpu PRNG bits.

        # ---- conv1 (3x3, padding=1) + residual (skip is None) + skip_scale ----
        out = conv3x3(h1, w1_ref, b1_ref) + x
        if skip_scale != 1.0:
            out = out * skip_scale
        o_ref[...] = out                                     # lane-dense store

    return kernel


def unet_block_forward_lane_major(x2d, emb, params, *, B, H, W, eps=1e-5,
                                  skip_scale=1.0, conv_dtype=jnp.float32,
                                  images_per_block=None, vmem_limit_bytes=None):
    """UNetBlock forward on channels-major, lane-dense activations.

    x2d: (Cp, B*H*W) f32 with channels zero-padded to a multiple of 8 on sublanes
    and batch*spatial on lanes.  Returns the same layout, so consecutive UNet
    blocks can be chained without repaying the NCHW <-> lane-major relayout.
    """
    f32 = jnp.float32
    HW = H * W
    N = B * HW
    C_in = int(params["norm0_w"].shape[0])
    C_out = int(params["conv0_w"].shape[0])
    if C_in != C_out:
        # TODO(synk): skip 1x1 projection / up-down resample path not implemented.
        raise NotImplementedError("requires in_channels == out_channels (skip is None)")
    C = C_in
    Cp = _round_up(C, 8)
    if tuple(x2d.shape) != (Cp, N):
        raise ValueError(f"x2d must have shape ({Cp}, {N}), got {x2d.shape}")

    # GroupNorm(num_groups=32, min_channels_per_group=4)
    G = min(32, C // 4)
    if G < 1 or C % G != 0:
        raise ValueError("unsupported channel count for GroupNorm grouping")

    # Grid over images ("parallel"): on v7x this splits the batch across both
    # TensorCores; with images_per_block=None the whole batch is one step
    # (cheapest on 1-TC v5e/v6e at small sizes: ~0.35us per extra grid step).
    ipb = B if images_per_block is None else int(images_per_block)
    if ipb < 1 or B % ipb != 0 or ((B // ipb) > 1 and (ipb * HW) % 128 != 0):
        ipb = B
    num_blocks = B // ipb
    Nb = ipb * HW

    # ---- host-side constants (keeps //, %, weight packing off the TPU VPU) ----
    def pad_rows(a, rows):
        a = jnp.asarray(a, f32)
        return jnp.pad(a, ((0, rows - a.shape[0]),) + ((0, 0),) * (a.ndim - 1))

    def col(v):                                     # (C,) -> (Cp, 1)
        return pad_rows(jnp.asarray(v, f32).reshape(-1, 1), Cp)

    def group_avg():                                # (Cp, Cp) per-group averaging matrix
        cg = C // G
        g = np.arange(C) // cg
        m = np.zeros((Cp, Cp), np.float32)
        m[:C, :C] = (g[:, None] == g[None, :]).astype(np.float32) / float(cg * HW)
        return jnp.asarray(m)

    def conv_stack(w):                              # (O,I,3,3) -> (Cp, 9*Cp), tap-major
        O, I, _, _ = w.shape
        w9 = jnp.transpose(jnp.asarray(w, f32), (0, 2, 3, 1))        # (O, 3, 3, I)
        w9 = jnp.pad(w9, ((0, Cp - O), (0, 0), (0, 0), (0, Cp - I)))
        return w9.reshape(Cp, 9 * Cp).astype(conv_dtype)

    # Lane -> image selectors (for GroupNorm stats + per-image broadcasts) and
    # 3x3 border masks (shared by both convs); all integer //, % stays on the host.
    img = np.arange(N) // HW
    sel_np = (img[:, None] == np.arange(B)[None, :]).astype(np.float32)
    sel = jnp.asarray(sel_np)                       # (N, B)
    selt = jnp.asarray(np.ascontiguousarray(sel_np.T))   # (B, N)

    q = np.arange(N) % HW
    yy, xx = q // W, q % W
    rows = []
    for dy in (-1, 0, 1):
        for dx in (-1, 0, 1):
            rows.append((yy + dy >= 0) & (yy + dy < H) & (xx + dx >= 0) & (xx + dx < W))
    mask9 = jnp.asarray(np.stack(rows, axis=0).astype(np.float32))    # (9, N)

    aw = jnp.asarray(params["aff_w"], f32)
    ab = jnp.asarray(params["aff_b"], f32).reshape(-1, 1)

    x_op = x2d.astype(f32)
    emb_t = jnp.transpose(jnp.asarray(emb, f32), (1, 0))              # (E, B)

    operands = (
        x_op, emb_t, mask9, sel, selt,
        group_avg(), col(params["norm0_w"]), col(params["norm0_b"]),
        conv_stack(params["conv0_w"]), col(params["conv0_b"]),
        pad_rows(aw[:C], Cp), pad_rows(ab[:C], Cp),                   # scale part
        pad_rows(aw[C:], Cp), pad_rows(ab[C:], Cp),                   # shift part
        group_avg(), col(params["norm1_w"]), col(params["norm1_b"]),
        conv_stack(params["conv1_w"]), col(params["conv1_b"]),
    )

    def _const2d(a):
        return pl.BlockSpec(a.shape, lambda i: (0, 0))

    in_specs = [
        pl.BlockSpec((Cp, Nb), lambda i: (0, i)),       # x          (lane-blocked)
        _const2d(emb_t),                                # emb        (E, B)
        pl.BlockSpec((9, Nb), lambda i: (0, i)),        # 3x3 border masks
        pl.BlockSpec((Nb, B), lambda i: (i, 0)),        # lane -> image one-hot
        pl.BlockSpec((B, Nb), lambda i: (0, i)),        # image -> lane broadcast
    ] + [_const2d(a) for a in operands[5:]]

    out_specs = pl.BlockSpec((Cp, Nb), lambda i: (0, i))

    if vmem_limit_bytes is None:
        # Working set per block (x2 pipelining headroom), clamped so the same code
        # stays inside v7x's 64 MiB while still exceeding v5e's 16 MiB default.
        est = 32 * Cp * Nb * 4 + (4 << 20)
        vmem_limit_bytes = int(min(max(est, 16 << 20), 64 << 20))

    kernel = _make_unet_block_kernel(W=W, Nb=Nb, eps=eps,
                                     skip_scale=skip_scale, conv_dtype=conv_dtype)

    out2d = pl.pallas_call(
        kernel,
        out_shape=jax.ShapeDtypeStruct((Cp, N), f32),
        grid_spec=pltpu.PrefetchScalarGridSpec(
            num_scalar_prefetch=0,
            grid=(num_blocks,),
            in_specs=in_specs,
            out_specs=out_specs),
        compiler_params=pltpu.CompilerParams(
            dimension_semantics=("parallel",),
            vmem_limit_bytes=vmem_limit_bytes),
    )(*operands)
    return out2d


def unet_block_forward(x, emb, params, *, eps=1e-5, skip_scale=1.0,
                       conv_dtype=jnp.float32, images_per_block=None,
                       vmem_limit_bytes=None):
    """NCHW convenience wrapper.  For stacks of UNet blocks, convert to the
    lane-major layout once and chain unet_block_forward_lane_major instead, so
    the relayout HBM passes amortize to zero."""
    B, C, H, W = x.shape
    Cp = _round_up(C, 8)
    x2d = jnp.transpose(x.astype(jnp.float32), (1, 0, 2, 3)).reshape(C, B * H * W)
    x2d = jnp.pad(x2d, ((0, Cp - C), (0, 0)))
    out2d = unet_block_forward_lane_major(
        x2d, emb, params, B=B, H=H, W=W, eps=eps, skip_scale=skip_scale,
        conv_dtype=conv_dtype, images_per_block=images_per_block,
        vmem_limit_bytes=vmem_limit_bytes)
    C_out = int(params["conv0_w"].shape[0])
    return jnp.transpose(out2d[:C_out].reshape(C_out, B, H, W), (1, 0, 2, 3))


def unet_block_reference(x, emb, params, *, eps=1e-5, skip_scale=1.0):
    """Pure-JAX (XLA) reference for the same UNetBlock configuration."""
    B, C_in, H, W = x.shape
    C_out = params["conv0_w"].shape[0]
    G0 = min(32, C_in // 4)
    G1 = min(32, C_out // 4)

    def gn(v, w, b, groups):
        Bv, C, Hh, Ww = v.shape
        vg = v.reshape(Bv, groups, C // groups, Hh, Ww)
        mu = vg.mean(axis=(2, 3, 4), keepdims=True)
        var = ((vg - mu) ** 2).mean(axis=(2, 3, 4), keepdims=True)
        vn = ((vg - mu) / jnp.sqrt(var + eps)).reshape(Bv, C, Hh, Ww)
        return vn * w.reshape(1, -1, 1, 1) + b.reshape(1, -1, 1, 1)

    def conv3(v, w, b):
        y = lax.conv_general_dilated(
            v, w, window_strides=(1, 1), padding="SAME",
            dimension_numbers=("NCHW", "OIHW", "NCHW"),
            precision=lax.Precision.HIGHEST)
        return y + b.reshape(1, -1, 1, 1)

    silu = lambda v: v * jax.nn.sigmoid(v)

    orig = x
    h = conv3(silu(gn(x, params["norm0_w"], params["norm0_b"], G0)),
              params["conv0_w"], params["conv0_b"])
    aff = jnp.dot(emb, params["aff_w"].T,
                  precision=lax.Precision.HIGHEST) + params["aff_b"]
    scale, shift = aff[:, :C_out], aff[:, C_out:]
    h = silu(shift[:, :, None, None]
             + gn(h, params["norm1_w"], params["norm1_b"], G1)
             * (scale[:, :, None, None] + 1.0))
    h = conv3(h, params["conv1_w"], params["conv1_b"])
    return (h + orig) * skip_scale


if __name__ == "__main__":
    B, C, H, W = 2, 4, 16, 16     # in_channels = out_channels = 4
    E = 8                         # emb_channels

    key = jax.random.PRNGKey(0)
    ks = jax.random.split(key, 12)
    x = jax.random.normal(ks[0], (B, C, H, W), dtype=jnp.float32)
    emb = jax.random.normal(ks[1], (B, E), dtype=jnp.float32)

    params = {
        "norm0_w": 1.0 + 0.1 * jax.random.normal(ks[2], (C,), dtype=jnp.float32),
        "norm0_b": 0.1 * jax.random.normal(ks[3], (C,), dtype=jnp.float32),
        "conv0_w": (1.0 / np.sqrt(C * 9))
                   * jax.random.normal(ks[4], (C, C, 3, 3), dtype=jnp.float32),
        "conv0_b": 0.1 * jax.random.normal(ks[5], (C,), dtype=jnp.float32),
        "aff_w": (1.0 / np.sqrt(E))
                 * jax.random.normal(ks[6], (2 * C, E), dtype=jnp.float32),
        "aff_b": 0.1 * jax.random.normal(ks[7], (2 * C,), dtype=jnp.float32),
        "norm1_w": 1.0 + 0.1 * jax.random.normal(ks[8], (C,), dtype=jnp.float32),
        "norm1_b": 0.1 * jax.random.normal(ks[9], (C,), dtype=jnp.float32),
        "conv1_w": (1.0 / np.sqrt(C * 9))
                   * jax.random.normal(ks[10], (C, C, 3, 3), dtype=jnp.float32),
        "conv1_b": 0.1 * jax.random.normal(ks[11], (C,), dtype=jnp.float32),
    }

    ref = unet_block_reference(x, emb, params)

    # (1) Default path: f32 conv dots, whole batch in one "parallel" grid step.
    out = jax.block_until_ready(unet_block_forward(x, emb, params))
    np.testing.assert_allclose(np.asarray(out), np.asarray(ref), rtol=2e-4, atol=2e-4)

    # (2) Grid split over images (how v7x keeps both TensorCores busy).
    out_split = jax.block_until_ready(
        unet_block_forward(x, emb, params, images_per_block=1))
    np.testing.assert_allclose(np.asarray(out_split), np.asarray(ref),
                               rtol=2e-4, atol=2e-4)

    # (3) bf16 conv operands for the v6e/v7x MXU (f32 accumulation); GroupNorm/SiLU
    #     stay f32, so only the convs see bf16 rounding -> loose sanity tolerance.
    out_bf16 = jax.block_until_ready(
        unet_block_forward(x, emb, params, conv_dtype=jnp.bfloat16))
    np.testing.assert_allclose(np.asarray(out_bf16), np.asarray(ref),
                               rtol=1e-1, atol=1e-1)

    print("KERNEL_OK")
</pallas_src>

<mosaic_0001>
module attributes {stable_mosaic.version = 11 : i64} {
  func.func @kernel(%arg0: i32, %arg1: memref<8x512xf32, #tpu.memory_space<vmem>>, %arg2: memref<8x2xf32, #tpu.memory_space<vmem>>, %arg3: memref<9x512xf32, #tpu.memory_space<vmem>>, %arg4: memref<512x2xf32, #tpu.memory_space<vmem>>, %arg5: memref<2x512xf32, #tpu.memory_space<vmem>>, %arg6: memref<8x8xf32, #tpu.memory_space<vmem>>, %arg7: memref<8x1xf32, #tpu.memory_space<vmem>>, %arg8: memref<8x1xf32, #tpu.memory_space<vmem>>, %arg9: memref<8x72xf32, #tpu.memory_space<vmem>>, %arg10: memref<8x1xf32, #tpu.memory_space<vmem>>, %arg11: memref<8x8xf32, #tpu.memory_space<vmem>>, %arg12: memref<8x1xf32, #tpu.memory_space<vmem>>, %arg13: memref<8x8xf32, #tpu.memory_space<vmem>>, %arg14: memref<8x1xf32, #tpu.memory_space<vmem>>, %arg15: memref<8x8xf32, #tpu.memory_space<vmem>>, %arg16: memref<8x1xf32, #tpu.memory_space<vmem>>, %arg17: memref<8x1xf32, #tpu.memory_space<vmem>>, %arg18: memref<8x72xf32, #tpu.memory_space<vmem>>, %arg19: memref<8x1xf32, #tpu.memory_space<vmem>>, %arg20: memref<8x512xf32, #tpu.memory_space<vmem>>) attributes {dimension_semantics = [#tpu.dimension_semantics<parallel>], iteration_bounds = array<i64: 1>, scalar_prefetch = 0 : i64, scratch_operands = 0 : i64, tpu.core_type = #tpu.core_type<tc>, window_params = [{transform_indices = @transform_0, window_bounds = array<i64: 8, 512>}, {pipeline_mode = #tpu.pipeline_mode<synchronous>, transform_indices = @transform_1, window_bounds = array<i64: 8, 2>}, {transform_indices = @transform_2, window_bounds = array<i64: 9, 512>}, {transform_indices = @transform_3, window_bounds = array<i64: 512, 2>}, {transform_indices = @transform_4, window_bounds = array<i64: 2, 512>}, {pipeline_mode = #tpu.pipeline_mode<synchronous>, transform_indices = @transform_5, window_bounds = array<i64: 8, 8>}, {pipeline_mode = #tpu.pipeline_mode<synchronous>, transform_indices = @transform_6, window_bounds = array<i64: 8, 1>}, {pipeline_mode = #tpu.pipeline_mode<synchronous>, transform_indices = @transform_7, window_bounds = array<i64: 8, 1>}, {pipeline_mode = #tpu.pipeline_mode<synchronous>, transform_indices = @transform_8, window_bounds = array<i64: 8, 72>}, {pipeline_mode = #tpu.pipeline_mode<synchronous>, transform_indices = @transform_9, window_bounds = array<i64: 8, 1>}, {pipeline_mode = #tpu.pipeline_mode<synchronous>, transform_indices = @transform_10, window_bounds = array<i64: 8, 8>}, {pipeline_mode = #tpu.pipeline_mode<synchronous>, transform_indices = @transform_11, window_bounds = array<i64: 8, 1>}, {pipeline_mode = #tpu.pipeline_mode<synchronous>, transform_indices = @transform_12, window_bounds = array<i64: 8, 8>}, {pipeline_mode = #tpu.pipeline_mode<synchronous>, transform_indices = @transform_13, window_bounds = array<i64: 8, 1>}, {pipeline_mode = #tpu.pipeline_mode<synchronous>, transform_indices = @transform_14, window_bounds = array<i64: 8, 8>}, {pipeline_mode = #tpu.pipeline_mode<synchronous>, transform_indices = @transform_15, window_bounds = array<i64: 8, 1>}, {pipeline_mode = #tpu.pipeline_mode<synchronous>, transform_indices = @transform_16, window_bounds = array<i64: 8, 1>}, {pipeline_mode = #tpu.pipeline_mode<synchronous>, transform_indices = @transform_17, window_bounds = array<i64: 8, 72>}, {pipeline_mode = #tpu.pipeline_mode<synchronous>, transform_indices = @transform_18, window_bounds = array<i64: 8, 1>}, {transform_indices = @transform_19, window_bounds = array<i64: 8, 512>}]} {
    %c0 = arith.constant 0 : index
    %c0_0 = arith.constant 0 : index
    %0 = vector.load %arg1[%c0, %c0_0] : memref<8x512xf32, #tpu.memory_space<vmem>>, vector<8x512xf32>
    %c0_1 = arith.constant 0 : index
    %c0_2 = arith.constant 0 : index
    %1 = vector.load %arg4[%c0_1, %c0_2] : memref<512x2xf32, #tpu.memory_space<vmem>>, vector<512x2xf32>
    %c0_3 = arith.constant 0 : index
    %c0_4 = arith.constant 0 : index
    %2 = vector.load %arg5[%c0_3, %c0_4] : memref<2x512xf32, #tpu.memory_space<vmem>>, vector<2x512xf32>
    %c0_5 = arith.constant 0 : index
    %c0_6 = arith.constant 0 : index
    %3 = vector.load %arg6[%c0_5, %c0_6] : memref<8x8xf32, #tpu.memory_space<vmem>>, vector<8x8xf32>
    %cst = arith.constant dense<0.000000e+00> : vector<8x2xf32>
    %4 = tpu.matmul %0, %1, %cst {dimension_numbers = #tpu.dot_dimension_numbers<[1], [0], [0], [1], [0, 0, 1, 1], [], []>} : vector<8x512xf32>, vector<512x2xf32>, vector<8x2xf32> -> vector<8x2xf32>
    %cst_7 = arith.constant dense<0.000000e+00> : vector<8x2xf32>
    %5 = tpu.matmul %3, %4, %cst_7 {dimension_numbers = #tpu.dot_dimension_numbers<[1], [0], [0], [1], [0, 0, 1, 1], [], []>} : vector<8x8xf32>, vector<8x2xf32>, vector<8x2xf32> -> vector<8x2xf32>
    %cst_8 = arith.constant dense<0.000000e+00> : vector<8x512xf32>
    %6 = tpu.matmul %5, %2, %cst_8 {dimension_numbers = #tpu.dot_dimension_numbers<[1], [0], [0], [1], [0, 0, 1, 1], [], []>} : vector<8x2xf32>, vector<2x512xf32>, vector<8x512xf32> -> vector<8x512xf32>
    %7 = arith.subf %0, %6 : vector<8x512xf32>
    %8 = arith.mulf %7, %7 : vector<8x512xf32>
    %cst_9 = arith.constant dense<0.000000e+00> : vector<8x2xf32>
    %9 = tpu.matmul %8, %1, %cst_9 {dimension_numbers = #tpu.dot_dimension_numbers<[1], [0], [0], [1], [0, 0, 1, 1], [], []>} : vector<8x512xf32>, vector<512x2xf32>, vector<8x2xf32> -> vector<8x2xf32>
    %cst_10 = arith.constant dense<0.000000e+00> : vector<8x2xf32>
    %10 = tpu.matmul %3, %9, %cst_10 {dimension_numbers = #tpu.dot_dimension_numbers<[1], [0], [0], [1], [0, 0, 1, 1], [], []>} : vector<8x8xf32>, vector<8x2xf32>, vector<8x2xf32> -> vector<8x2xf32>
    %cst_11 = arith.constant 9.99999974E-6 : f32
    %11 = vector.broadcast %cst_11 : f32 to vector<8x2xf32>
    %12 = arith.addf %10, %11 : vector<8x2xf32>
    %13 = math.rsqrt %12 : vector<8x2xf32>
    %c0_12 = arith.constant 0 : index
    %c0_13 = arith.constant 0 : index
    %14 = vector.load %arg7[%c0_12, %c0_13] : memref<8x1xf32, #tpu.memory_space<vmem>>, vector<8x1xf32>
    %15 = vector.broadcast %14 : vector<8x1xf32> to vector<8x2xf32>
    %16 = arith.mulf %13, %15 : vector<8x2xf32>
    %cst_14 = arith.constant dense<0.000000e+00> : vector<8x512xf32>
    %17 = tpu.matmul %16, %2, %cst_14 {dimension_numbers = #tpu.dot_dimension_numbers<[1], [0], [0], [1], [0, 0, 1, 1], [], []>} : vector<8x2xf32>, vector<2x512xf32>, vector<8x512xf32> -> vector<8x512xf32>
    %18 = arith.mulf %7, %17 : vector<8x512xf32>
    %c0_15 = arith.constant 0 : index
    %c0_16 = arith.constant 0 : index
    %19 = vector.load %arg8[%c0_15, %c0_16] : memref<8x1xf32, #tpu.memory_space<vmem>>, vector<8x1xf32>
    %20 = vector.broadcast %19 : vector<8x1xf32> to vector<8x512xf32>
    %21 = arith.addf %18, %20 : vector<8x512xf32>
    %22 = arith.negf %21 : vector<8x512xf32>
    %23 = math.exp %22 : vector<8x512xf32>
    %cst_17 = arith.constant 1.000000e+00 : f32
    %24 = vector.broadcast %cst_17 : f32 to vector<8x512xf32>
    %25 = arith.addf %24, %23 : vector<8x512xf32>
    %26 = arith.divf %24, %25 : vector<8x512xf32>
    %27 = arith.mulf %21, %26 : vector<8x512xf32>
    %c17_i32 = arith.constant 17 : i32
    %28 = tpu.dynamic_rotate %27 by %c17_i32 dim 1 : vector<8x512xf32>, i32 -> vector<8x512xf32>
    %c0_18 = arith.constant 0 : index
    %c0_19 = arith.constant 0 : index
    %29 = vector.load %arg3[%c0_18, %c0_19] : memref<9x512xf32, #tpu.memory_space<vmem>>, vector<1x512xf32>
    %30 = vector.broadcast %29 : vector<1x512xf32> to vector<8x512xf32>
    %31 = arith.mulf %28, %30 : vector<8x512xf32>
    %c16_i32 = arith.constant 16 : i32
    %32 = tpu.dynamic_rotate %27 by %c16_i32 dim 1 : vector<8x512xf32>, i32 -> vector<8x512xf32>
    %c1 = arith.constant 1 : index
    %c0_20 = arith.constant 0 : index
    %33 = vector.load %arg3[%c1, %c0_20] : memref<9x512xf32, #tpu.memory_space<vmem>>, vector<1x512xf32>
    %34 = vector.broadcast %33 : vector<1x512xf32> to vector<8x512xf32>
    %35 = arith.mulf %32, %34 : vector<8x512xf32>
    %c15_i32 = arith.constant 15 : i32
    %36 = tpu.dynamic_rotate %27 by %c15_i32 dim 1 : vector<8x512xf32>, i32 -> vector<8x512xf32>
    %c2 = arith.constant 2 : index
    %c0_21 = arith.constant 0 : index
    %37 = vector.load %arg3[%c2, %c0_21] : memref<9x512xf32, #tpu.memory_space<vmem>>, vector<1x512xf32>
    %38 = vector.broadcast %37 : vector<1x512xf32> to vector<8x512xf32>
    %39 = arith.mulf %36, %38 : vector<8x512xf32>
    %c1_i32 = arith.constant 1 : i32
    %40 = tpu.dynamic_rotate %27 by %c1_i32 dim 1 : vector<8x512xf32>, i32 -> vector<8x512xf32>
    %c3 = arith.constant 3 : index
    %c0_22 = arith.constant 0 : index
    %41 = vector.load %arg3[%c3, %c0_22] : memref<9x512xf32, #tpu.memory_space<vmem>>, vector<1x512xf32>
    %42 = vector.broadcast %41 : vector<1x512xf32> to vector<8x512xf32>
    %43 = arith.mulf %40, %42 : vector<8x512xf32>
    %c511_i32 = arith.constant 511 : i32
    %44 = tpu.dynamic_rotate %27 by %c511_i32 dim 1 : vector<8x512xf32>, i32 -> vector<8x512xf32>
    %c5 = arith.constant 5 : index
    %c0_23 = arith.constant 0 : index
    %45 = vector.load %arg3[%c5, %c0_23] : memref<9x512xf32, #tpu.memory_space<vmem>>, vector<1x512xf32>
    %46 = vector.broadcast %45 : vector<1x512xf32> to vector<8x512xf32>
    %47 = arith.mulf %44, %46 : vector<8x512xf32>
    %c497_i32 = arith.constant 497 : i32
    %48 = tpu.dynamic_rotate %27 by %c497_i32 dim 1 : vector<8x512xf32>, i32 -> vector<8x512xf32>
    %c6 = arith.constant 6 : index
    %c0_24 = arith.constant 0 : index
    %49 = vector.load %arg3[%c6, %c0_24] : memref<9x512xf32, #tpu.memory_space<vmem>>, vector<1x512xf32>
    %50 = vector.broadcast %49 : vector<1x512xf32> to vector<8x512xf32>
    %51 = arith.mulf %48, %50 : vector<8x512xf32>
    %c496_i32 = arith.constant 496 : i32
    %52 = tpu.dynamic_rotate %27 by %c496_i32 dim 1 : vector<8x512xf32>, i32 -> vector<8x512xf32>
    %c7 = arith.constant 7 : index
    %c0_25 = arith.constant 0 : index
    %53 = vector.load %arg3[%c7, %c0_25] : memref<9x512xf32, #tpu.memory_space<vmem>>, vector<1x512xf32>
    %54 = vector.broadcast %53 : vector<1x512xf32> to vector<8x512xf32>
    %55 = arith.mulf %52, %54 : vector<8x512xf32>
    %c495_i32 = arith.constant 495 : i32
    %56 = tpu.dynamic_rotate %27 by %c495_i32 dim 1 : vector<8x512xf32>, i32 -> vector<8x512xf32>
    %c8 = arith.constant 8 : index
    %c0_26 = arith.constant 0 : index
    %57 = vector.load %arg3[%c8, %c0_26] : memref<9x512xf32, #tpu.memory_space<vmem>>, vector<1x512xf32>
    %58 = vector.broadcast %57 : vector<1x512xf32> to vector<8x512xf32>
    %59 = arith.mulf %56, %58 : vector<8x512xf32>
    %60 = tpu.concatenate %31, %35, %39, %43, %27, %47, %51, %55, %59 in 0 : vector<8x512xf32>, vector<8x512xf32>, vector<8x512xf32>, vector<8x512xf32>, vector<8x512xf32>, vector<8x512xf32>, vector<8x512xf32>, vector<8x512xf32>, vector<8x512xf32> -> vector<72x512xf32>
    %c0_27 = arith.constant 0 : index
    %c0_28 = arith.constant 0 : index
    %61 = vector.load %arg9[%c0_27, %c0_28] : memref<8x72xf32, #tpu.memory_space<vmem>>, vector<8x72xf32>
    %cst_29 = arith.constant dense<0.000000e+00> : vector<8x512xf32>
    %62 = tpu.matmul %61, %60, %cst_29 {dimension_numbers = #tpu.dot_dimension_numbers<[1], [0], [0], [1], [0, 0, 1, 1], [], []>} : vector<8x72xf32>, vector<72x512xf32>, vector<8x512xf32> -> vector<8x512xf32>
    %c0_30 = arith.constant 0 : index
    %c0_31 = arith.constant 0 : index
    %63 = vector.load %arg10[%c0_30, %c0_31] : memref<8x1xf32, #tpu.memory_space<vmem>>, vector<8x1xf32>
    %64 = vector.broadcast %63 : vector<8x1xf32> to vector<8x512xf32>
    %65 = arith.addf %62, %64 : vector<8x512xf32>
    %c0_32 = arith.constant 0 : index
    %c0_33 = arith.constant 0 : index
    %66 = vector.load %arg2[%c0_32, %c0_33] : memref<8x2xf32, #tpu.memory_space<vmem>>, vector<8x2xf32>
    %c0_34 = arith.constant 0 : index
    %c0_35 = arith.constant 0 : index
    %67 = vector.load %arg11[%c0_34, %c0_35] : memref<8x8xf32, #tpu.memory_space<vmem>>, vector<8x8xf32>
    %cst_36 = arith.constant dense<0.000000e+00> : vector<8x2xf32>
    %68 = tpu.matmul %67, %66, %cst_36 {dimension_numbers = #tpu.dot_dimension_numbers<[1], [0], [0], [1], [0, 0, 1, 1], [], []>} : vector<8x8xf32>, vector<8x2xf32>, vector<8x2xf32> -> vector<8x2xf32>
    %c0_37 = arith.constant 0 : index
    %c0_38 = arith.constant 0 : index
    %69 = vector.load %arg12[%c0_37, %c0_38] : memref<8x1xf32, #tpu.memory_space<vmem>>, vector<8x1xf32>
    %70 = vector.broadcast %69 : vector<8x1xf32> to vector<8x2xf32>
    %71 = arith.addf %68, %70 : vector<8x2xf32>
    %c0_39 = arith.constant 0 : index
    %c0_40 = arith.constant 0 : index
    %72 = vector.load %arg13[%c0_39, %c0_40] : memref<8x8xf32, #tpu.memory_space<vmem>>, vector<8x8xf32>
    %cst_41 = arith.constant dense<0.000000e+00> : vector<8x2xf32>
    %73 = tpu.matmul %72, %66, %cst_41 {dimension_numbers = #tpu.dot_dimension_numbers<[1], [0], [0], [1], [0, 0, 1, 1], [], []>} : vector<8x8xf32>, vector<8x2xf32>, vector<8x2xf32> -> vector<8x2xf32>
    %c0_42 = arith.constant 0 : index
    %c0_43 = arith.constant 0 : index
    %74 = vector.load %arg14[%c0_42, %c0_43] : memref<8x1xf32, #tpu.memory_space<vmem>>, vector<8x1xf32>
    %75 = vector.broadcast %74 : vector<8x1xf32> to vector<8x2xf32>
    %76 = arith.addf %73, %75 : vector<8x2xf32>
    %c0_44 = arith.constant 0 : index
    %c0_45 = arith.constant 0 : index
    %77 = vector.load %arg15[%c0_44, %c0_45] : memref<8x8xf32, #tpu.memory_space<vmem>>, vector<8x8xf32>
    %cst_46 = arith.constant dense<0.000000e+00> : vector<8x2xf32>
    %78 = tpu.matmul %65, %1, %cst_46 {dimension_numbers = #tpu.dot_dimension_numbers<[1], [0], [0], [1], [0, 0, 1, 1], [], []>} : vector<8x512xf32>, vector<512x2xf32>, vector<8x2xf32> -> vector<8x2xf32>
    %cst_47 = arith.constant dense<0.000000e+00> : vector<8x2xf32>
    %79 = tpu.matmul %77, %78, %cst_47 {dimension_numbers = #tpu.dot_dimension_numbers<[1], [0], [0], [1], [0, 0, 1, 1], [], []>} : vector<8x8xf32>, vector<8x2xf32>, vector<8x2xf32> -> vector<8x2xf32>
    %cst_48 = arith.constant dense<0.000000e+00> : vector<8x512xf32>
    %80 = tpu.matmul %79, %2, %cst_48 {dimension_numbers = #tpu.dot_dimension_numbers<[1], [0], [0], [1], [0, 0, 1, 1], [], []>} : vector<8x2xf32>, vector<2x512xf32>, vector<8x512xf32> -> vector<8x512xf32>
    %81 = arith.subf %65, %80 : vector<8x512xf32>
    %82 = arith.mulf %81, %81 : vector<8x512xf32>
    %cst_49 = arith.constant dense<0.000000e+00> : vector<8x2xf32>
    %83 = tpu.matmul %82, %1, %cst_49 {dimension_numbers = #tpu.dot_dimension_numbers<[1], [0], [0], [1], [0, 0, 1, 1], [], []>} : vector<8x512xf32>, vector<512x2xf32>, vector<8x2xf32> -> vector<8x2xf32>
    %cst_50 = arith.constant dense<0.000000e+00> : vector<8x2xf32>
    %84 = tpu.matmul %77, %83, %cst_50 {dimension_numbers = #tpu.dot_dimension_numbers<[1], [0], [0], [1], [0, 0, 1, 1], [], []>} : vector<8x8xf32>, vector<8x2xf32>, vector<8x2xf32> -> vector<8x2xf32>
    %cst_51 = arith.constant 9.99999974E-6 : f32
    %85 = vector.broadcast %cst_51 : f32 to vector<8x2xf32>
    %86 = arith.addf %84, %85 : vector<8x2xf32>
    %87 = math.rsqrt %86 : vector<8x2xf32>
    %cst_52 = arith.constant 1.000000e+00 : f32
    %88 = vector.broadcast %cst_52 : f32 to vector<8x2xf32>
    %89 = arith.addf %71, %88 : vector<8x2xf32>
    %c0_53 = arith.constant 0 : index
    %c0_54 = arith.constant 0 : index
    %90 = vector.load %arg16[%c0_53, %c0_54] : memref<8x1xf32, #tpu.memory_space<vmem>>, vector<8x1xf32>
    %91 = vector.broadcast %90 : vector<8x1xf32> to vector<8x2xf32>
    %92 = arith.mulf %87, %91 : vector<8x2xf32>
    %93 = arith.mulf %92, %89 : vector<8x2xf32>
    %c0_55 = arith.constant 0 : index
    %c0_56 = arith.constant 0 : index
    %94 = vector.load %arg17[%c0_55, %c0_56] : memref<8x1xf32, #tpu.memory_space<vmem>>, vector<8x1xf32>
    %95 = vector.broadcast %94 : vector<8x1xf32> to vector<8x2xf32>
    %96 = arith.mulf %95, %89 : vector<8x2xf32>
    %97 = arith.addf %96, %76 : vector<8x2xf32>
    %cst_57 = arith.constant dense<0.000000e+00> : vector<8x512xf32>
    %98 = tpu.matmul %93, %2, %cst_57 {dimension_numbers = #tpu.dot_dimension_numbers<[1], [0], [0], [1], [0, 0, 1, 1], [], []>} : vector<8x2xf32>, vector<2x512xf32>, vector<8x512xf32> -> vector<8x512xf32>
    %99 = arith.mulf %81, %98 : vector<8x512xf32>
    %cst_58 = arith.constant dense<0.000000e+00> : vector<8x512xf32>
    %100 = tpu.matmul %97, %2, %cst_58 {dimension_numbers = #tpu.dot_dimension_numbers<[1], [0], [0], [1], [0, 0, 1, 1], [], []>} : vector<8x2xf32>, vector<2x512xf32>, vector<8x512xf32> -> vector<8x512xf32>
    %101 = arith.addf %99, %100 : vector<8x512xf32>
    %102 = arith.negf %101 : vector<8x512xf32>
    %103 = math.exp %102 : vector<8x512xf32>
    %cst_59 = arith.constant 1.000000e+00 : f32
    %104 = vector.broadcast %cst_59 : f32 to vector<8x512xf32>
    %105 = arith.addf %104, %103 : vector<8x512xf32>
    %106 = arith.divf %104, %105 : vector<8x512xf32>
    %107 = arith.mulf %101, %106 : vector<8x512xf32>
    %c17_i32_60 = arith.constant 17 : i32
    %108 = tpu.dynamic_rotate %107 by %c17_i32_60 dim 1 : vector<8x512xf32>, i32 -> vector<8x512xf32>
    %c0_61 = arith.constant 0 : index
    %c0_62 = arith.constant 0 : index
    %109 = vector.load %arg3[%c0_61, %c0_62] : memref<9x512xf32, #tpu.memory_space<vmem>>, vector<1x512xf32>
    %110 = vector.broadcast %109 : vector<1x512xf32> to vector<8x512xf32>
    %111 = arith.mulf %108, %110 : vector<8x512xf32>
    %c16_i32_63 = arith.constant 16 : i32
    %112 = tpu.dynamic_rotate %107 by %c16_i32_63 dim 1 : vector<8x512xf32>, i32 -> vector<8x512xf32>
    %c1_64 = arith.constant 1 : index
    %c0_65 = arith.constant 0 : index
    %113 = vector.load %arg3[%c1_64, %c0_65] : memref<9x512xf32, #tpu.memory_space<vmem>>, vector<1x512xf32>
    %114 = vector.broadcast %113 : vector<1x512xf32> to vector<8x512xf32>
    %115 = arith.mulf %112, %114 : vector<8x512xf32>
    %c15_i32_66 = arith.constant 15 : i32
    %116 = tpu.dynamic_rotate %107 by %c15_i32_66 dim 1 : vector<8x512xf32>, i32 -> vector<8x512xf32>
    %c2_67 = arith.constant 2 : index
    %c0_68 = arith.constant 0 : index
    %117 = vector.load %arg3[%c2_67, %c0_68] : memref<9x512xf32, #tpu.memory_space<vmem>>, vector<1x512xf32>
    %118 = vector.broadcast %117 : vector<1x512xf32> to vector<8x512xf32>
    %119 = arith.mulf %116, %118 : vector<8x512xf32>
    %c1_i32_69 = arith.constant 1 : i32
    %120 = tpu.dynamic_rotate %107 by %c1_i32_69 dim 1 : vector<8x512xf32>, i32 -> vector<8x512xf32>
    %c3_70 = arith.constant 3 : index
    %c0_71 = arith.constant 0 : index
    %121 = vector.load %arg3[%c3_70, %c0_71] : memref<9x512xf32, #tpu.memory_space<vmem>>, vector<1x512xf32>
    %122 = vector.broadcast %121 : vector<1x512xf32> to vector<8x512xf32>
    %123 = arith.mulf %120, %122 : vector<8x512xf32>
    %c511_i32_72 = arith.constant 511 : i32
    %124 = tpu.dynamic_rotate %107 by %c511_i32_72 dim 1 : vector<8x512xf32>, i32 -> vector<8x512xf32>
    %c5_73 = arith.constant 5 : index
    %c0_74 = arith.constant 0 : index
    %125 = vector.load %arg3[%c5_73, %c0_74] : memref<9x512xf32, #tpu.memory_space<vmem>>, vector<1x512xf32>
    %126 = vector.broadcast %125 : vector<1x512xf32> to vector<8x512xf32>
    %127 = arith.mulf %124, %126 : vector<8x512xf32>
    %c497_i32_75 = arith.constant 497 : i32
    %128 = tpu.dynamic_rotate %107 by %c497_i32_75 dim 1 : vector<8x512xf32>, i32 -> vector<8x512xf32>
    %c6_76 = arith.constant 6 : index
    %c0_77 = arith.constant 0 : index
    %129 = vector.load %arg3[%c6_76, %c0_77] : memref<9x512xf32, #tpu.memory_space<vmem>>, vector<1x512xf32>
    %130 = vector.broadcast %129 : vector<1x512xf32> to vector<8x512xf32>
    %131 = arith.mulf %128, %130 : vector<8x512xf32>
    %c496_i32_78 = arith.constant 496 : i32
    %132 = tpu.dynamic_rotate %107 by %c496_i32_78 dim 1 : vector<8x512xf32>, i32 -> vector<8x512xf32>
    %c7_79 = arith.constant 7 : index
    %c0_80 = arith.constant 0 : index
    %133 = vector.load %arg3[%c7_79, %c0_80] : memref<9x512xf32, #tpu.memory_space<vmem>>, vector<1x512xf32>
    %134 = vector.broadcast %133 : vector<1x512xf32> to vector<8x512xf32>
    %135 = arith.mulf %132, %134 : vector<8x512xf32>
    %c495_i32_81 = arith.constant 495 : i32
    %136 = tpu.dynamic_rotate %107 by %c495_i32_81 dim 1 : vector<8x512xf32>, i32 -> vector<8x512xf32>
    %c8_82 = arith.constant 8 : index
    %c0_83 = arith.constant 0 : index
    %137 = vector.load %arg3[%c8_82, %c0_83] : memref<9x512xf32, #tpu.memory_space<vmem>>, vector<1x512xf32>
    %138 = vector.broadcast %137 : vector<1x512xf32> to vector<8x512xf32>
    %139 = arith.mulf %136, %138 : vector<8x512xf32>
    %140 = tpu.concatenate %111, %115, %119, %123, %107, %127, %131, %135, %139 in 0 : vector<8x512xf32>, vector<8x512xf32>, vector<8x512xf32>, vector<8x512xf32>, vector<8x512xf32>, vector<8x512xf32>, vector<8x512xf32>, vector<8x512xf32>, vector<8x512xf32> -> vector<72x512xf32>
    %c0_84 = arith.constant 0 : index
    %c0_85 = arith.constant 0 : index
    %141 = vector.load %arg18[%c0_84, %c0_85] : memref<8x72xf32, #tpu.memory_space<vmem>>, vector<8x72xf32>
    %cst_86 = arith.constant dense<0.000000e+00> : vector<8x512xf32>
    %142 = tpu.matmul %141, %140, %cst_86 {dimension_numbers = #tpu.dot_dimension_numbers<[1], [0], [0], [1], [0, 0, 1, 1], [], []>} : vector<8x72xf32>, vector<72x512xf32>, vector<8x512xf32> -> vector<8x512xf32>
    %c0_87 = arith.constant 0 : index
    %c0_88 = arith.constant 0 : index
    %143 = vector.load %arg19[%c0_87, %c0_88] : memref<8x1xf32, #tpu.memory_space<vmem>>, vector<8x1xf32>
    %144 = vector.broadcast %143 : vector<8x1xf32> to vector<8x512xf32>
    %145 = arith.addf %142, %144 : vector<8x512xf32>
    %146 = arith.addf %145, %0 : vector<8x512xf32>
    %c0_89 = arith.constant 0 : index
    %c0_90 = arith.constant 0 : index
    %147 = vector.load %arg20[%c0_89, %c0_90] : memref<8x512xf32, #tpu.memory_space<vmem>>, vector<8x512xf32>
    tpu.vector_store %arg20[%c0_89, %c0_90], %146 {strides = array<i32>} : memref<8x512xf32, #tpu.memory_space<vmem>>, vector<8x512xf32>,
    return
  }
  func.func @transform_0(%arg0: i32) -> (i32, i32) {
    %c0_i32 = arith.constant 0 : i32
    %c0_i32_0 = arith.constant 0 : i32
    return %c0_i32, %arg0 : i32, i32
  }
  func.func @transform_1(%arg0: i32) -> (i32, i32) {
    %c0_i32 = arith.constant 0 : i32
    %c0_i32_0 = arith.constant 0 : i32
    %c0_i32_1 = arith.constant 0 : i32
    return %c0_i32, %c0_i32_0 : i32, i32
  }
  func.func @transform_2(%arg0: i32) -> (i32, i32) {
    %c0_i32 = arith.constant 0 : i32
    %c0_i32_0 = arith.constant 0 : i32
    return %c0_i32, %arg0 : i32, i32
  }
  func.func @transform_3(%arg0: i32) -> (i32, i32) {
    %c0_i32 = arith.constant 0 : i32
    %c0_i32_0 = arith.constant 0 : i32
    return %arg0, %c0_i32 : i32, i32
  }
  func.func @transform_4(%arg0: i32) -> (i32, i32) {
    %c0_i32 = arith.constant 0 : i32
    %c0_i32_0 = arith.constant 0 : i32
    return %c0_i32, %arg0 : i32, i32
  }
  func.func @transform_5(%arg0: i32) -> (i32, i32) {
    %c0_i32 = arith.constant 0 : i32
    %c0_i32_0 = arith.constant 0 : i32
    %c0_i32_1 = arith.constant 0 : i32
    return %c0_i32, %c0_i32_0 : i32, i32
  }
  func.func @transform_6(%arg0: i32) -> (i32, i32) {
    %c0_i32 = arith.constant 0 : i32
    %c0_i32_0 = arith.constant 0 : i32
    %c0_i32_1 = arith.constant 0 : i32
    return %c0_i32, %c0_i32_0 : i32, i32
  }
  func.func @transform_7(%arg0: i32) -> (i32, i32) {
    %c0_i32 = arith.constant 0 : i32
    %c0_i32_0 = arith.constant 0 : i32
    %c0_i32_1 = arith.constant 0 : i32
    return %c0_i32, %c0_i32_0 : i32, i32
  }
  func.func @transform_8(%arg0: i32) -> (i32, i32) {
    %c0_i32 = arith.constant 0 : i32
    %c0_i32_0 = arith.constant 0 : i32
    %c0_i32_1 = arith.constant 0 : i32
    return %c0_i32, %c0_i32_0 : i32, i32
  }
  func.func @transform_9(%arg0: i32) -> (i32, i32) {
    %c0_i32 = arith.constant 0 : i32
    %c0_i32_0 = arith.constant 0 : i32
    %c0_i32_1 = arith.constant 0 : i32
    return %c0_i32, %c0_i32_0 : i32, i32
  }
  func.func @transform_10(%arg0: i32) -> (i32, i32) {
    %c0_i32 = arith.constant 0 : i32
    %c0_i32_0 = arith.constant 0 : i32
    %c0_i32_1 = arith.constant 0 : i32
    return %c0_i32, %c0_i32_0 : i32, i32
  }
  func.func @transform_11(%arg0: i32) -> (i32, i32) {
    %c0_i32 = arith.constant 0 : i32
    %c0_i32_0 = arith.constant 0 : i32
    %c0_i32_1 = arith.constant 0 : i32
    return %c0_i32, %c0_i32_0 : i32, i32
  }
  func.func @transform_12(%arg0: i32) -> (i32, i32) {
    %c0_i32 = arith.constant 0 : i32
    %c0_i32_0 = arith.constant 0 : i32
    %c0_i32_1 = arith.constant 0 : i32
    return %c0_i32, %c0_i32_0 : i32, i32
  }
  func.func @transform_13(%arg0: i32) -> (i32, i32) {
    %c0_i32 = arith.constant 0 : i32
    %c0_i32_0 = arith.constant 0 : i32
    %c0_i32_1 = arith.constant 0 : i32
    return %c0_i32, %c0_i32_0 : i32, i32
  }
  func.func @transform_14(%arg0: i32) -> (i32, i32) {
    %c0_i32 = arith.constant 0 : i32
    %c0_i32_0 = arith.constant 0 : i32
    %c0_i32_1 = arith.constant 0 : i32
    return %c0_i32, %c0_i32_0 : i32, i32
  }
  func.func @transform_15(%arg0: i32) -> (i32, i32) {
    %c0_i32 = arith.constant 0 : i32
    %c0_i32_0 = arith.constant 0 : i32
    %c0_i32_1 = arith.constant 0 : i32
    return %c0_i32, %c0_i32_0 : i32, i32
  }
  func.func @transform_16(%arg0: i32) -> (i32, i32) {
    %c0_i32 = arith.constant 0 : i32
    %c0_i32_0 = arith.constant 0 : i32
    %c0_i32_1 = arith.constant 0 : i32
    return %c0_i32, %c0_i32_0 : i32, i32
  }
  func.func @transform_17(%arg0: i32) -> (i32, i32) {
    %c0_i32 = arith.constant 0 : i32
    %c0_i32_0 = arith.constant 0 : i32
    %c0_i32_1 = arith.constant 0 : i32
    return %c0_i32, %c0_i32_0 : i32, i32
  }
  func.func @transform_18(%arg0: i32) -> (i32, i32) {
    %c0_i32 = arith.constant 0 : i32
    %c0_i32_0 = arith.constant 0 : i32
    %c0_i32_1 = arith.constant 0 : i32
    return %c0_i32, %c0_i32_0 : i32, i32
  }
  func.func @transform_19(%arg0: i32) -> (i32, i32) {
    %c0_i32 = arith.constant 0 : i32
    %c0_i32_0 = arith.constant 0 : i32
    return %c0_i32, %arg0 : i32, i32
  }
}

</mosaic_0001>

<bundles_post_ra>
// kernel: tpu_custom_call.1
= control target key start
LH: loop header
LB: loop body
LE: loop exit
PB: predicated region body
PF: predicated region fallthrough
CT: control target
= control target key end

     0   :  { %s5040_s0 = inlined_call_operand.vmem [shape: f32[8,512], index: 0, kind: input, shape index: {}]   ;;  %s5041_s1 = inlined_call_operand.vmem [shape: f32[8,2], index: 1, kind: input, shape index: {}]   ;;  %s5042_s2 = inlined_call_operand.vmem [shape: f32[9,512], index: 2, kind: input, shape index: {}]   ;;  %s5043_s3 = inlined_call_operand.vmem [shape: f32[512,2], index: 3, kind: input, shape index: {}]   ;;  %s5044_s4 = inlined_call_operand.vmem [shape: f32[2,512], index: 4, kind: input, shape index: {}]   ;;  %s5045_s5 = inlined_call_operand.vmem [shape: f32[8,8], index: 5, kind: input, shape index: {}]   ;;  %s5046_s6 = inlined_call_operand.vmem [shape: f32[8,1], index: 6, kind: input, shape index: {}]   ;;  %s5047_s7 = inlined_call_operand.vmem [shape: f32[8,1], index: 7, kind: input, shape index: {}]   ;;  %s5048_s8 = inlined_call_operand.vmem [shape: f32[8,72], index: 8, kind: input, shape index: {}]   ;;  %s5049_s9 = inlined_call_operand.vmem [shape: f32[8,1], index: 9, kind: input, shape index: {}]   ;;  %s5050_s10 = inlined_call_operand.vmem [shape: f32[8,8], index: 10, kind: input, shape index: {}]   ;;  %s5051_s11 = inlined_call_operand.vmem [shape: f32[8,1], index: 11, kind: input, shape index: {}]   ;;  %s5052_s12 = inlined_call_operand.vmem [shape: f32[8,8], index: 12, kind: input, shape index: {}]   ;;  %s5053_s13 = inlined_call_operand.vmem [shape: f32[8,1], index: 13, kind: input, shape index: {}]   ;;  %s5054_s14 = inlined_call_operand.vmem [shape: f32[8,8], index: 14, kind: input, shape index: {}]   ;;  %s5055_s15 = inlined_call_operand.vmem [shape: f32[8,1], index: 15, kind: input, shape index: {}]   ;;  %s5056_s16 = inlined_call_operand.vmem [shape: f32[8,1], index: 16, kind: input, shape index: {}]   ;;  %s5057_s17 = inlined_call_operand.vmem [shape: f32[8,72], index: 17, kind: input, shape index: {}]   ;;  %s5058_s18 = inlined_call_operand.vmem [shape: f32[8,1], index: 18, kind: input, shape index: {}]   ;;  %s5059_s19 = inlined_call_operand.hbm [shape: f32[8,512], index: 19, kind: output, shape index: {}]  }
   0x1   :  { %5141 = sst [smem:[#allocation61_spill]] %s5040_s0 }
   0x2   :  { %5142 = sst [smem:[#allocation62_spill]] %s5041_s1 }
   0x3   :  { %5143 = sst [smem:[#allocation63_spill]] %s5042_s2 }
   0x4   :  { %5144 = sst [smem:[#allocation64_spill]] %s5043_s3 }
   0x5   :  { %s5145_s20 = sld [smem:[#allocation64_spill]] }
   0xb   :  { %v3426_v0 = vld [vmem:[%s5145_s20 + $0xf8] sm:$0xff]  ;;  %v3448_v4 = vld [vmem:[%s5145_s20 + $0xf0] sm:$0xff]  ;;  %v3470_v8 = vld [vmem:[%s5145_s20 + $0xe8] sm:$0xff] }
   0xc   :  { %v3431_v1 = vld [vmem:[%s5145_s20 + $0x1f8] sm:$0xff]  ;;  %2846 = vmatprep.subr.mxu0 %v3426_v0  ;;  %v3453_v5 = vld [vmem:[%s5145_s20 + $0x1f0] sm:$0xff]  ;;  %v3477_v9 = vld [vmem:[%s5145_s20 + $0x1e8] sm:$0xff] }
   0xd   :  { %v3436_v2 = vld [vmem:[%s5145_s20 + $0x78] sm:$0xff]  ;;  %2881 = vmatprep.subr.mxu1 %v3431_v1  ;;  %v3460_v6 = vld [vmem:[%s5145_s20 + $0x70] sm:$0xff]  ;;  %v3482_v10 = vld [vmem:[%s5145_s20 + $0x68] sm:$0xff] }
   0xe   :  { %v3443_v3 = vld [vmem:[%s5145_s20 + $0x178] sm:$0xff]  ;;  %2847 = vmatpush3.msra.mxu0 %v3436_v2  ;;  %v3465_v7 = vld [vmem:[%s5145_s20 + $0x170] sm:$0xff]  ;;  %v3487_v11 = vld [vmem:[%s5145_s20 + $0x168] sm:$0xff] }
   0xf   :  { %2882 = vmatpush3.msra.mxu1 %v3443_v3  ;;  %2848 = vmatprep.subr.mxu0 %v3448_v4  ;;  %v3494_v12 = vld [vmem:[%s5145_s20 + $0xe0] sm:$0xff]  ;;  %v3518_v16 = vld [vmem:[%s5145_s20 + $0xd8] sm:$0xff]  ;;  %v3542_v20 = vld [vmem:[%s5145_s20 + $0xd0] sm:$0xff] }
  0x10   :  { %2883 = vmatprep.subr.mxu1 %v3453_v5  ;;  %2849 = vmatpush3.msra.mxu0 %v3460_v6  ;;  %v3499_v13 = vld [vmem:[%s5145_s20 + $0x1e0] sm:$0xff]  ;;  %v3523_v17 = vld [vmem:[%s5145_s20 + $0x1d8] sm:$0xff]  ;;  %v3547_v21 = vld [vmem:[%s5145_s20 + $0x1d0] sm:$0xff] }
  0x11   :  { %2884 = vmatpush3.msra.mxu1 %v3465_v7  ;;  %2850 = vmatprep.subr.mxu0 %v3470_v8  ;;  %v3506_v14 = vld [vmem:[%s5145_s20 + $0x60] sm:$0xff]  ;;  %v3530_v18 = vld [vmem:[%s5145_s20 + $0x58] sm:$0xff]  ;;  %v3554_v22 = vld [vmem:[%s5145_s20 + $0x50] sm:$0xff] }
  0x12   :  { %2885 = vmatprep.subr.mxu1 %v3477_v9  ;;  %v3511_v15 = vld [vmem:[%s5145_s20 + $0x160] sm:$0xff]  ;;  %2851 = vmatpush3.msra.mxu0 %v3482_v10  ;;  %v3535_v19 = vld [vmem:[%s5145_s20 + $0x158] sm:$0xff]  ;;  %v3559_v23 = vld [vmem:[%s5145_s20 + $0x150] sm:$0xff] }
  0x13   :  { %2886 = vmatpush3.msra.mxu1 %v3487_v11  ;;  %2852 = vmatprep.subr.mxu0 %v3494_v12  ;;  %v3566_v24 = vld [vmem:[%s5145_s20 + $0xc8] sm:$0xff]  ;;  %v3590_v28 = vld [vmem:[%s5145_s20 + $0xc0] sm:$0xff]  ;;  %v3614_v32 = vld [vmem:[%s5145_s20 + $0xb8] sm:$0xff] }
  0x14   :  { %2887 = vmatprep.subr.mxu1 %v3499_v13  ;;  %2853 = vmatpush3.msra.mxu0 %v3506_v14  ;;  %v3571_v25 = vld [vmem:[%s5145_s20 + $0x1c8] sm:$0xff]  ;;  %v3595_v29 = vld [vmem:[%s5145_s20 + $0x1c0] sm:$0xff]  ;;  %v3619_v33 = vld [vmem:[%s5145_s20 + $0x1b8] sm:$0xff] }
  0x15   :  { %2888 = vmatpush3.msra.mxu1 %v3511_v15  ;;  %2854 = vmatprep.subr.mxu0 %v3518_v16  ;;  %v3578_v26 = vld [vmem:[%s5145_s20 + $0x48] sm:$0xff]  ;;  %v3602_v30 = vld [vmem:[%s5145_s20 + $0x40] sm:$0xff]  ;;  %v3626_v34 = vld [vmem:[%s5145_s20 + $0x38] sm:$0xff] }
  0x16   :  { %2889 = vmatprep.subr.mxu1 %v3523_v17  ;;  %2855 = vmatpush3.msra.mxu0 %v3530_v18  ;;  %v3583_v27 = vld [vmem:[%s5145_s20 + $0x148] sm:$0xff]  ;;  %v3607_v31 = vld [vmem:[%s5145_s20 + $0x140] sm:$0xff]  ;;  %v3631_v35 = vld [vmem:[%s5145_s20 + $0x138] sm:$0xff] }
  0x17   :  { %2890 = vmatpush3.msra.mxu1 %v3535_v19  ;;  %2856 = vmatprep.subr.mxu0 %v3542_v20  ;;  %v3638_v36 = vld [vmem:[%s5145_s20 + $0xb0] sm:$0xff]  ;;  %v3662_v40 = vld [vmem:[%s5145_s20 + $0xa8] sm:$0xff]  ;;  %v3686_v44 = vld [vmem:[%s5145_s20 + $0xa0] sm:$0xff] }
  0x18   :  { %2891 = vmatprep.subr.mxu1 %v3547_v21  ;;  %2857 = vmatpush3.msra.mxu0 %v3554_v22  ;;  %v3643_v37 = vld [vmem:[%s5145_s20 + $0x1b0] sm:$0xff]  ;;  %v3667_v41 = vld [vmem:[%s5145_s20 + $0x1a8] sm:$0xff]  ;;  %v3691_v45 = vld [vmem:[%s5145_s20 + $0x1a0] sm:$0xff] }
  0x19   :  { %2892 = vmatpush3.msra.mxu1 %v3559_v23  ;;  %2858 = vmatprep.subr.mxu0 %v3566_v24  ;;  %v3650_v38 = vld [vmem:[%s5145_s20 + $0x30] sm:$0xff]  ;;  %v3674_v42 = vld [vmem:[%s5145_s20 + $0x28] sm:$0xff]  ;;  %v3698_v46 = vld [vmem:[%s5145_s20 + $0x20] sm:$0xff] }
  0x1a   :  { %2893 = vmatprep.subr.mxu1 %v3571_v25  ;;  %2859 = vmatpush3.msra.mxu0 %v3578_v26  ;;  %v3655_v39 = vld [vmem:[%s5145_s20 + $0x130] sm:$0xff]  ;;  %v3679_v43 = vld [vmem:[%s5145_s20 + $0x128] sm:$0xff]  ;;  %v3703_v47 = vld [vmem:[%s5145_s20 + $0x120] sm:$0xff] }
  0x1b   :  { %2894 = vmatpush3.msra.mxu1 %v3583_v27  ;;  %2860 = vmatprep.subr.mxu0 %v3590_v28  ;;  %v3710_v48 = vld [vmem:[%s5145_s20 + $0x98] sm:$0xff] }
  0x1c   :  { %2895 = vmatprep.subr.mxu1 %v3595_v29  ;;  %2861 = vmatpush3.msra.mxu0 %v3602_v30  ;;  %v3715_v49 = vld [vmem:[%s5145_s20 + $0x198] sm:$0xff] }
  0x1d   :  { %2896 = vmatpush3.msra.mxu1 %v3607_v31  ;;  %2862 = vmatprep.subr.mxu0 %v3614_v32 }
  0x1e   :  { %2897 = vmatprep.subr.mxu1 %v3619_v33  ;;  %2863 = vmatpush3.msra.mxu0 %v3626_v34 }
  0x1f   :  { %2898 = vmatpush3.msra.mxu1 %v3631_v35  ;;  %2864 = vmatprep.subr.mxu0 %v3638_v36 }
  0x20   :  { %2899 = vmatprep.subr.mxu1 %v3643_v37  ;;  %2865 = vmatpush3.msra.mxu0 %v3650_v38 }
  0x21   :  { %2900 = vmatpush3.msra.mxu1 %v3655_v39  ;;  %2866 = vmatprep.subr.mxu0 %v3662_v40 }
  0x22   :  { %2901 = vmatprep.subr.mxu1 %v3667_v41  ;;  %2867 = vmatpush3.msra.mxu0 %v3674_v42 }
  0x23   :  { %2902 = vmatpush3.msra.mxu1 %v3679_v43 }
  0x24   :  { %24 = vsyncpa [#allocation3], 0  ;;  %2868 = vmatprep.subr.mxu0 %v3686_v44  ;;  %2903 = vmatprep.subr.mxu1 %v3691_v45  ;;  %v3722_v50 = vld [vmem:[%s5145_s20 + $0x18] sm:$0xff]  ;;  %v3734_v52 = vld [vmem:[%s5145_s20 + $0x90] sm:$0xff]  ;;  %s5156_s21 = sld [smem:[#allocation61_spill]]  ;;  %vm3311_vm0 = vmmov 0  }
  0x25   :  { %v3727_v51 = vld [vmem:[%s5145_s20 + $0x118] sm:$0xff]  ;;  %2869 = vmatpush3.msra.mxu0 %v3698_v46  ;;  %2904 = vmatpush3.msra.mxu1 %v3703_v47  ;;  %v3739_v53 = vld [vmem:[%s5145_s20 + $0x190] sm:$0xff]  ;;  %v3758_v56 = vld [vmem:[%s5145_s20 + $0x88] sm:$0xff]  ;;  %vm369_vm1 = vcmask 1041408   ;;  %vm273_vm2 = vcmask 64512   ;;  %vm365_vm3 = vcmask 15360  }
  0x26   :  { %5146 = vst [vmem:[#allocation5_spill] sm:$0xff] %v3739_v53  ;;  %2870 = vmatprep.subr.mxu0 %v3710_v48  ;;  %2905 = vmatprep.subr.mxu1 %v3715_v49  ;;  %v3746_v54 = vld [vmem:[%s5145_s20 + $0x10] sm:$0xff]  ;;  %5149 = vst [vmem:[#allocation8_spill] sm:$0xff] %v3758_v56  ;;  %v3763_v57 = vld [vmem:[%s5145_s20 + $0x188] sm:$0xff]  ;;  %s3316_s22 = smov 113   ;;  %s3317_s2 = smov 127  }
  0x27   :  { %5147 = vst [vmem:[#allocation6_spill] sm:$0xff] %v3746_v54  ;;  %v3751_v55 = vld [vmem:[%s5145_s20 + $0x110] sm:$0xff]  ;;  %2871 = vmatpush3.msra.mxu0 %v3722_v50  ;;  %2906 = vmatpush3.msra.mxu1 %v3727_v51  ;;  %5150 = vst [vmem:[#allocation9_spill] sm:$0xff] %v3763_v57  ;;  %v3770_v58 = vld [vmem:[%s5145_s20 + $0x8] sm:$0xff]  ;;  %s3318_s23 = smov 1   ;;  %s3319_s24 = smov 15  }
  0x28   :  { %5148 = vst [vmem:[#allocation7_spill] sm:$0xff] %v3751_v55  ;;  %2872 = vmatprep.subr.mxu0 %v3734_v52  ;;  %2907 = vmatprep.subr.mxu1 %v3739_v53  ;;  %5151 = vst [vmem:[#allocation10_spill] sm:$0xff] %v3770_v58  ;;  %v3775_v59 = vld [vmem:[%s5145_s20 + $0x108] sm:$0xff]  ;;  %v3782_v60 = vld [vmem:[%s5145_s20 + $0x80] sm:$0xff]  ;;  %s3320_s25 = smov 16   ;;  %s3321_s3 = smov 17  }
  0x29   :  { %5152 = vst [vmem:[#allocation11_spill] sm:$0xff] %v3775_v59  ;;  %2873 = vmatpush3.msra.mxu0 %v3746_v54  ;;  %2908 = vmatpush3.msra.mxu1 %v3751_v55  ;;  %5153 = vst [vmem:[#allocation12_spill] sm:$0xff] %v3782_v60  ;;  %v3787_v61 = vld [vmem:[%s5145_s20 + $0x180] sm:$0xff]  ;;  %s5184_s26 = sld [smem:[#allocation63_spill]]  ;;  %vm1261_vm12 = vcmask 588800  }
  0x2a   :  { %5154 = vst [vmem:[#allocation13_spill] sm:$0xff] %v3787_v61  ;;  %2874 = vmatprep.subr.mxu0 %v3758_v56  ;;  %2909 = vmatprep.subr.mxu1 %v3763_v57  ;;  %v3794_v62 = vld [vmem:[%s5145_s20] sm:$0xff]  ;;  %v3799_v63 = vld [vmem:[%s5156_s21 + $0x8] sm:$0xff]  ;;  %v3811_v57 = vld [vmem:[%s5156_s21 + $0x18] sm:$0xff] }
  0x2b   :  { %5155 = vst [vmem:[#allocation14_spill] sm:$0xff] %v3794_v62  ;;  %5157 = vst [vmem:[#allocation15_spill] sm:$0xff] %v3799_v63  ;;  %2875 = vmatpush3.msra.mxu0 %v3770_v58  ;;  %2910 = vmatpush3.msra.mxu1 %v3775_v59  ;;  %v3806_v56 = vld [vmem:[%s5145_s20 + $0x100] sm:$0xff]  ;;  %v3823_v59 = vld [vmem:[%s5156_s21 + $0x10] sm:$0xff] }
  0x2c   :  { %5158 = vst [vmem:[#allocation16_spill] sm:$0xff] %v3806_v56  ;;  %5159 = vst [vmem:[#allocation17_spill] sm:$0xff] %v3811_v57  ;;  %2876 = vmatprep.subr.mxu0 %v3782_v60  ;;  %2911 = vmatprep.subr.mxu1 %v3787_v61  ;;  %v3818_v58 = vld [vmem:[%s5156_s21] sm:$0xff]  ;;  %v5078_v61 = vmov 0.0  }
  0x2d   :  { %5160 = vst [vmem:[#allocation18_spill] sm:$0xff] %v3818_v58  ;;  %5161 = vst [vmem:[#allocation19_spill] sm:$0xff] %v3823_v59  ;;  %2877 = vmatpush3.msra.mxu0 %v3794_v62  ;;  %197 = vmatprep.mubr.f32.mxu0 %v3799_v63  ;;  %v131_v63 = vld [vmem:[%s5044_s4] sm:$0xff]  ;;  %v3312_v62 = vmov 1983009808   ;;  %s5217_s4 = sld [smem:[#allocation62_spill]] }
  0x2e   :  { %2912 = vmatpush3.msra.mxu1 %v3806_v56  ;;  %267 = vmatprep.mubr.f32.mxu1 %v3811_v57  ;;  %v5080_v56 = vlaneseq  ;;  %v350_v57 = vunpack.c.l.s4 %v3312_v62  ;;  %v348_v60 = vcombine.high %v131_v63, %v131_v63 }
  0x2f   :  { %198 = vmatmul.mubr.f32.vlgmr.msra.gmra.mxu0 %v3818_v58  ;;  %268 = vmatmul.mubr.f32.vlgmr.msra.gmra.mxu1 %v3823_v59 }
  0x30   :  { %3138 = vmatprep.subr.mxu0 %v5078_v61  ;;  %442 = vmatprep.mubr.f32.mxu1 %v5078_v61  ;;  %v3839_v58 = vshrl.u32 %v5080_v56, 7  ;;  %v351_v59 = vunpack.c.0.s8 %v350_v57 }
  0x31   :  { %3140 = vmatprep.mubr.msk.f32.mxu0 %vm3311_vm0, %v5078_v61 }
  0x32   :  { %5162 = vst [vmem:[#allocation20_spill] sm:$0xff] %v3839_v58  ;;  %v354_v55 = vsub.s32 %v351_v59, %v3839_v58 }
  0x34   :  { %v3842_v54 = vrot.slane %v131_v63, %v354_v55  ;;  %v3844_v53 = vrot.slane %v348_v60, %v354_v55 }
  0x36   :  { %v3848_v61 = vcombine.high %v3842_v54, %v3842_v54  ;;  %v3857_v60 = vcombine.high %v3844_v53, %v3844_v53 }
  0x38   :  { %5163 = vst [vmem:[#allocation21_spill] sm:$0xff] %v3848_v61  ;;  %2792 = vmatprep.subr.msk.mxu1 %vm369_vm1, %v3848_v61  ;;  %v3862_v61 = vld [vmem:[%s5045_s5] sm:$0xff] }
  0x39   :  { %2793 = vmatpush1.msk.msra.mxu1 %vm369_vm1, %v3842_v54 }
  0x3a   :  { %2918 = vmatprep.subr.mxu1 %v3426_v0  ;;  %v5164_v0 = vmov 0.0  }
  0xef   :  { %v2878_v57 = vpop.f32.mrf.mxu0  ;;  %v2913_v62 = vpop.f32.mrf.mxu1 }
  0xf1   :  { %v2879_v59 = vpop.f32.mrf.mxu0  ;;  %v2914_v63 = vpop.f32.mrf.mxu1 }
  0xf2   :  { %v2880_v56 = vadd.f32 %v2879_v59, %v2878_v57  ;;  %v2915_v55 = vadd.f32 %v2914_v63, %v2913_v62 }
  0xf4   :  { %v270_v58 = vadd.f32 %v2915_v55, %v2880_v56 }
  0xf6   :  { %3139 = vmatpush3.msra.mxu0 %v270_v58 }
  0xf7   :  { %3141 = vmatmul.mubr.msk.f32.vlgmr.msra.gmra.mxu0 %vm273_vm2, %v3862_v61  ;;  %2795 = vmatprep.subr.msk.mxu0 %vm369_vm1, %v3857_v60 }
  0xf8   :  { %2796 = vmatpush1.msk.msra.mxu0 %vm369_vm1, %v3844_v53  ;;  %513 = vmatprep.mubr.f32.mxu0 %v5164_v0 }
  0xf9   :  { %2953 = vmatprep.subr.mxu0 %v3431_v1  ;;  %v5165_v1 = vld [vmem:[#allocation5_spill] sm:$0xff] }
 0x1b7   :  { %v343_v56 = vpop.f32.mrf.mxu0 }
 0x1b8   :  { %2794 = vmatmul.mubr.msk.f32.vlgmr.msra.gmra.mxu1 %vm365_vm3, %v343_v56  ;;  %2797 = vmatmul.mubr.msk.f32.vlgmr.msra.gmra.mxu0 %vm365_vm3, %v343_v56 }
 0x1b9   :  { %v3142_v58 = vpop.f32.mrf.mxu0  ;;  %2919 = vmatpush3.msra.mxu1 %v3436_v2  ;;  %2954 = vmatpush3.msra.mxu0 %v3443_v3  ;;  %v5166_v2 = vld [vmem:[#allocation6_spill] sm:$0xff]  ;;  %v5167_v3 = vld [vmem:[#allocation7_spill] sm:$0xff] }
 0x1ba   :  { %2920 = vmatprep.subr.mxu1 %v3448_v4  ;;  %2955 = vmatprep.subr.mxu0 %v3453_v5  ;;  %v5168_v4 = vld [vmem:[#allocation8_spill] sm:$0xff]  ;;  %v5169_v5 = vld [vmem:[#allocation9_spill] sm:$0xff] }
 0x1bb   :  { %2921 = vmatpush3.msra.mxu1 %v3460_v6  ;;  %2956 = vmatpush3.msra.mxu0 %v3465_v7  ;;  %v5170_v6 = vld [vmem:[#allocation10_spill] sm:$0xff]  ;;  %v5171_v7 = vld [vmem:[#allocation11_spill] sm:$0xff] }
 0x1bc   :  { %2922 = vmatprep.subr.mxu1 %v3470_v8  ;;  %2957 = vmatprep.subr.mxu0 %v3477_v9  ;;  %v5172_v8 = vld [vmem:[#allocation12_spill] sm:$0xff]  ;;  %v5173_v9 = vld [vmem:[#allocation13_spill] sm:$0xff] }
 0x1bd   :  { %2923 = vmatpush3.msra.mxu1 %v3482_v10  ;;  %2958 = vmatpush3.msra.mxu0 %v3487_v11  ;;  %v5174_v10 = vld [vmem:[#allocation14_spill] sm:$0xff]  ;;  %v5175_v11 = vld [vmem:[#allocation16_spill] sm:$0xff] }
 0x1be   :  { %2924 = vmatprep.subr.mxu1 %v3494_v12  ;;  %2959 = vmatprep.subr.mxu0 %v3499_v13  ;;  %v5176_v12 = vld [vmem:[#allocation21_spill] sm:$0xff] }
 0x1bf   :  { %2925 = vmatpush3.msra.mxu1 %v3506_v14  ;;  %2960 = vmatpush3.msra.mxu0 %v3511_v15  ;;  %v5177_v15 = vld [vmem:[#allocation18_spill] sm:$0xff] }
 0x1c0   :  { %2926 = vmatprep.subr.mxu1 %v3518_v16  ;;  %2961 = vmatprep.subr.mxu0 %v3523_v17  ;;  %v5178_v17 = vld [vmem:[#allocation19_spill] sm:$0xff] }
 0x1c1   :  { %2927 = vmatpush3.msra.mxu1 %v3530_v18  ;;  %2962 = vmatpush3.msra.mxu0 %v3535_v19 }
 0x1c2   :  { %2928 = vmatprep.subr.mxu1 %v3542_v20  ;;  %2963 = vmatprep.subr.mxu0 %v3547_v21  ;;  %v5179_v21 = vld [vmem:[#allocation15_spill] sm:$0xff] }
 0x1c3   :  { %2929 = vmatpush3.msra.mxu1 %v3554_v22  ;;  %2964 = vmatpush3.msra.mxu0 %v3559_v23  ;;  %v5180_v23 = vld [vmem:[#allocation17_spill] sm:$0xff] }
 0x1c4   :  { %2930 = vmatprep.subr.mxu1 %v3566_v24  ;;  %2965 = vmatprep.subr.mxu0 %v3571_v25 }
 0x1c5   :  { %2931 = vmatpush3.msra.mxu1 %v3578_v26  ;;  %2966 = vmatpush3.msra.mxu0 %v3583_v27 }
 0x1c6   :  { %2932 = vmatprep.subr.mxu1 %v3590_v28  ;;  %2967 = vmatprep.subr.mxu0 %v3595_v29  ;;  %v739_v29 = vld [vmem:[%s5046_s6] sm:$0xff]  ;;  %s3314_s6 = smov 111  }
 0x1c7   :  { %2933 = vmatpush3.msra.mxu1 %v3602_v30  ;;  %2968 = vmatpush3.msra.mxu0 %v3607_v31  ;;  %v3313_v30 = vmov 0   ;;  %v895_v31 = vld [vmem:[%s5047_s7] sm:$0xff]  ;;  %s3315_s7 = smov 112  }
 0x1c8   :  { %2934 = vmatprep.subr.mxu1 %v3614_v32  ;;  %2969 = vmatprep.subr.mxu0 %v3619_v33 }
 0x1c9   :  { %2935 = vmatpush3.msra.mxu1 %v3626_v34  ;;  %2970 = vmatpush3.msra.mxu0 %v3631_v35 }
 0x1ca   :  { %2936 = vmatprep.subr.mxu1 %v3638_v36  ;;  %2971 = vmatprep.subr.mxu0 %v3643_v37 }
 0x1cb   :  { %2937 = vmatpush3.msra.mxu1 %v3650_v38  ;;  %2972 = vmatpush3.msra.mxu0 %v3655_v39 }
 0x1cc   :  { %2938 = vmatprep.subr.mxu1 %v3662_v40  ;;  %2973 = vmatprep.subr.mxu0 %v3667_v41 }
 0x1cd   :  { %2939 = vmatpush3.msra.mxu1 %v3674_v42  ;;  %2974 = vmatpush3.msra.mxu0 %v3679_v43 }
 0x1ce   :  { %2940 = vmatprep.subr.mxu1 %v3686_v44  ;;  %2975 = vmatprep.subr.mxu0 %v3691_v45 }
 0x1cf   :  { %2941 = vmatpush3.msra.mxu1 %v3698_v46  ;;  %2976 = vmatpush3.msra.mxu0 %v3703_v47 }
 0x1d0   :  { %2942 = vmatprep.subr.mxu1 %v3710_v48  ;;  %2977 = vmatprep.subr.mxu0 %v3715_v49 }
 0x1d1   :  { %2943 = vmatpush3.msra.mxu1 %v3722_v50  ;;  %2978 = vmatpush3.msra.mxu0 %v3727_v51 }
 0x1d2   :  { %2944 = vmatprep.subr.mxu1 %v3734_v52  ;;  %2979 = vmatprep.subr.mxu0 %v5165_v1 }
 0x1d3   :  { %2945 = vmatpush3.msra.mxu1 %v5166_v2  ;;  %2980 = vmatpush3.msra.mxu0 %v5167_v3 }
 0x1d4   :  { %2946 = vmatprep.subr.mxu1 %v5168_v4  ;;  %2981 = vmatprep.subr.mxu0 %v5169_v5 }
 0x1d5   :  { %2947 = vmatpush3.msra.mxu1 %v5170_v6  ;;  %2982 = vmatpush3.msra.mxu0 %v5171_v7 }
 0x1d6   :  { %2948 = vmatprep.subr.mxu1 %v5172_v8  ;;  %2983 = vmatprep.subr.mxu0 %v5173_v9 }
 0x1d7   :  { %2949 = vmatpush3.msra.mxu1 %v5174_v10  ;;  %2984 = vmatpush3.msra.mxu0 %v5175_v11 }
 0x1d8   :  { %3143 = vmatprep.subr.mxu1 %v5164_v0  ;;  %2799 = vmatprep.subr.msk.mxu0 %vm369_vm1, %v5176_v12 }
 0x1d9   :  { %3181 = vset.pattern.permute.xlu0 %v3313_v30  ;;  %3182 = vset.pattern.permute.xlu1 %v3313_v30 }
 0x1da   :  { %742 = vperm.xlu0 %3181, %v739_v29   ;;  %v2815_v29 = vld [vmem:[%s5184_s26 + $0x20] ss:$8 sm:$0xf] }
 0x1de   :  { %898 = vperm.xlu0 %3181, %v895_v31  }
 0x255   :  { %v743_v43 = vpop.permute.xlu0 %742 }
 0x259   :  { %v899_v47 = vpop.permute.xlu0 %898 }
 0x278   :  { %v444_v13 = vpop.f32.mrf.mxu1  ;;  %v515_v14 = vpop.f32.mrf.mxu0 }
 0x279   :  { %v520_v16 = vsub.f32 %v5177_v15, %v444_v13  ;;  %v522_v18 = vsub.f32 %v5178_v17, %v515_v14 }
 0x27a   :  { %v446_v19 = vpop.f32.mrf.mxu1  ;;  %v517_v20 = vpop.f32.mrf.mxu0 }
 0x27b   :  { %v521_v22 = vsub.f32 %v5179_v21, %v446_v19  ;;  %v523_v24 = vsub.f32 %v5180_v23, %v517_v20  ;;  %v524_v27 = vmul.f32 %v520_v16, %v520_v16  ;;  %v526_v28 = vmul.f32 %v522_v18, %v522_v18  ;;  %v1255_v19 = vld [vmem:[%s5049_s9] sm:$0xff] }
 0x27c   :  { %v2147_v20 = vld [vmem:[%s5055_s15] sm:$0xff] }
 0x27d   :  { %v525_v25 = vmul.f32 %v521_v22, %v521_v22  ;;  %v527_v26 = vmul.f32 %v523_v24, %v523_v24  ;;  %v1409_v21 = vld [vmem:[%s5051_s11] sm:$0xff] }
 0x27e   :  { %v1489_v23 = vld [vmem:[%s5053_s13] sm:$0xff] }
 0x27f   :  { %592 = vmatprep.mubr.f32.mxu1 %v525_v25  ;;  %662 = vmatprep.mubr.f32.mxu0 %v527_v26  ;;  %v5183_v26 = vld [vmem:[#allocation20_spill] sm:$0xff] }
 0x280   :  { %593 = vmatmul.mubr.f32.vlgmr.msra.gmra.mxu1 %v524_v27  ;;  %663 = vmatmul.mubr.f32.vlgmr.msra.gmra.mxu0 %v526_v28  ;;  %v4056_v27 = vsub.s32 0, %v5183_v26  ;;  %v4059_v28 = vsub.s32 1, %v5183_v26 }
 0x281   :  { %3145 = vmatprep.mubr.msk.f32.mxu1 %vm3311_vm0, %v5164_v0  ;;  %2800 = vmatpush1.msk.msra.mxu0 %vm369_vm1, %v3842_v54 }
 0x282   :  { %813 = vmatprep.mubr.f32.mxu0 %v5164_v0 }
 0x340   :  { %v2950_v32 = vpop.f32.mrf.mxu1  ;;  %v2985_v33 = vpop.f32.mrf.mxu0 }
 0x342   :  { %v2951_v34 = vpop.f32.mrf.mxu1  ;;  %v2986_v35 = vpop.f32.mrf.mxu0 }
 0x343   :  { %v2952_v36 = vadd.f32 %v2951_v34, %v2950_v32  ;;  %v2987_v37 = vadd.f32 %v2986_v35, %v2985_v33  ;;  %v4066_v32 = vrot.slane %v2815_v29, %v4056_v27  ;;  %v4069_v33 = vrot.slane %v2815_v29, %v4059_v28 }
 0x344   :  { %v4072_v34 = vsub.s32 2, %v5183_v26  ;;  %v4075_v35 = vsub.s32 3, %v5183_v26 }
 0x345   :  { %v665_v38 = vadd.f32 %v2987_v37, %v2952_v36  ;;  %5185 = vst [vmem:[#allocation6_spill] sm:$0xff] %v4066_v32  ;;  %5186 = vst [vmem:[#allocation7_spill] sm:$0xff] %v4069_v33 }
 0x347   :  { %3144 = vmatpush3.msra.mxu1 %v665_v38 }
 0x348   :  { %3146 = vmatmul.mubr.msk.f32.vlgmr.msra.gmra.mxu1 %vm273_vm2, %v3862_v61  ;;  %2802 = vmatprep.subr.msk.mxu1 %vm369_vm1, %v3857_v60 }
 0x349   :  { %2803 = vmatpush1.msk.msra.mxu1 %vm369_vm1, %v3844_v53  ;;  %884 = vmatprep.mubr.f32.mxu1 %v5164_v0 }
 0x408   :  { %v734_v39 = vpop.f32.mrf.mxu1 }
 0x409   :  { %v735_v40 = vadd.f32 1e-05, %v734_v39 }
 0x40a   :  { %v3147_v41 = vpop.f32.mrf.mxu1 }
 0x40b   :  { %3184 = vrsqrt.f32 %v735_v40 }
 0x418   :  { %v3185_v42 = vpop.eup %3184 }
 0x419   :  { %v745_v44 = vmul.f32 %v3185_v42, %v743_v43  ;;  %v4084_v42 = vrot.slane %v2815_v29, %v4072_v34  ;;  %v4087_v43 = vrot.slane %v2815_v29, %v4075_v35 }
 0x41b   :  { %2801 = vmatmul.mubr.msk.f32.vlgmr.msra.gmra.mxu0 %vm365_vm3, %v745_v44  ;;  %2804 = vmatmul.mubr.msk.f32.vlgmr.msra.gmra.mxu1 %vm365_vm3, %v745_v44  ;;  %5187 = vst [vmem:[#allocation8_spill] sm:$0xff] %v4084_v42  ;;  %5188 = vst [vmem:[#allocation9_spill] sm:$0xff] %v4087_v43  ;;  %v2814_v44 = vld [vmem:[%s5184_s26 + $0x7] ss:$8 sm:$0xf] }
 0x41c   :  { %1329 = vmatprep.mubr.f32.mxu0 %v5164_v0  ;;  %1400 = vmatprep.mubr.f32.mxu1 %v5164_v0 }
 0x4db   :  { %v815_v45 = vpop.f32.mrf.mxu0  ;;  %v886_v46 = vpop.f32.mrf.mxu1 }
 0x4dc   :  { %v891_v48 = vmul.f32 %v815_v45, %v520_v16  ;;  %v893_v49 = vmul.f32 %v886_v46, %v522_v18 }
 0x4dd   :  { %v817_v50 = vpop.f32.mrf.mxu0  ;;  %v888_v51 = vpop.f32.mrf.mxu1 }
 0x4de   :  { %v901_v52 = vadd.f32 %v899_v47, %v891_v48  ;;  %v903_v61 = vadd.f32 %v899_v47, %v893_v49  ;;  %v892_v57 = vmul.f32 %v817_v50, %v521_v22  ;;  %v894_v62 = vmul.f32 %v888_v51, %v523_v24  ;;  %v2155_v22 = vld [vmem:[%s5056_s16] sm:$0xff] }
 0x4df   :  { %v5181_v24 = vlaneseq  ;;  %v4100_v51 = vrot.slane %v2814_v44, %v4056_v27 }
 0x4e0   :  { %v2805_v59 = vmul.f32 -1.442695, %v901_v52  ;;  %v2807_v63 = vmul.f32 -1.442695, %v903_v61  ;;  %v902_v55 = vadd.f32 %v899_v47, %v892_v57  ;;  %v904_v56 = vadd.f32 %v899_v47, %v894_v62 }
 0x4e1   :  { %v4053_v25 = vand.u32 127, %v5181_v24  ;;  %5189 = vst [vmem:[#allocation10_spill] sm:$0xff] %v4100_v51 }
 0x4e2   :  { %3186 = vpow2.f32 %v2805_v59  ;;  %v2806_v58 = vmul.f32 -1.442695, %v902_v55  ;;  %v2808_v1 = vmul.f32 -1.442695, %v904_v56 }
 0x4e3   :  { %3188 = vpow2.f32 %v2807_v63  ;;  %5182 = vst [vmem:[#allocation5_spill] sm:$0xff] %v4053_v25  ;;  %vm1222_vm4 = vcmp.lt.s32.totalorder %v4053_v25, 111  ;;  %vm1182_vm5 = vcmp.lt.s32.totalorder %v4053_v25, 112  ;;  %vm1142_vm6 = vcmp.lt.s32.totalorder %v4053_v25, 113 }
 0x4e4   :  { %3190 = vpow2.f32 %v2806_v58  ;;  %v4115_v58 = vrot.slane %v2814_v44, %v4075_v35  ;;  %vm1102_vm7 = vcmp.lt.s32.totalorder %v4053_v25, 127  ;;  %vm1062_vm8 = vcmp.lt.s32.totalorder %v4053_v25, 1 }
 0x4e5   :  { %3192 = vpow2.f32 %v2808_v1  ;;  %v2813_v1 = vld [vmem:[%s5184_s26 + $0x6] ss:$8 sm:$0xf]  ;;  %vm1022_vm9 = vcmp.lt.s32.totalorder %v4053_v25, 15  ;;  %vm982_vm10 = vcmp.lt.s32.totalorder %v4053_v25, 16  ;;  %vm943_vm11 = vcmp.lt.s32.totalorder %v4053_v25, 17 }
 0x4e6   :  { %5192 = vst [vmem:[#allocation13_spill] sm:$0xff] %v4115_v58  ;;  %v4668_v25 = vld [vmem:[%s5145_s20 + $0x188] sm:$0xff] }
 0x4e7   :  { %5231 = vst [vmem:[#allocation52_spill] sm:$0xff] %v4668_v25 }
 0x4ef   :  { %v3187_v2 = vpop.eup %3186 }
 0x4f0   :  { %v3189_v3 = vpop.eup %3188  ;;  %v917_v4 = vadd.f32 1.0, %v3187_v2 }
 0x4f1   :  { %v3191_v5 = vpop.eup %3190  ;;  %v919_v6 = vadd.f32 1.0, %v3189_v3 }
 0x4f2   :  { %v3193_v7 = vpop.eup %3192  ;;  %3194 = vrcp.f32 %v917_v4  ;;  %v918_v8 = vadd.f32 1.0, %v3191_v5 }
 0x4f3   :  { %3196 = vrcp.f32 %v919_v6  ;;  %v920_v9 = vadd.f32 1.0, %v3193_v7 }
 0x4f4   :  { %3198 = vrcp.f32 %v918_v8  ;;  %v4128_v8 = vrot.slane %v2813_v1, %v4056_v27 }
 0x4f5   :  { %3200 = vrcp.f32 %v920_v9  ;;  %v4131_v9 = vrot.slane %v2813_v1, %v4059_v28 }
 0x4f6   :  { %5193 = vst [vmem:[#allocation14_spill] sm:$0xff] %v4128_v8 }
 0x4f7   :  { %5194 = vst [vmem:[#allocation16_spill] sm:$0xff] %v4131_v9 }
 0x4ff   :  { %v3195_v10 = vpop.eup %3194 }
 0x500   :  { %v3197_v11 = vpop.eup %3196  ;;  %v3965_v13 = vmul.f32 %v3195_v10, %v901_v52  ;;  %v4103_v52 = vrot.slane %v2814_v44, %v4059_v28 }
 0x501   :  { %v3199_v14 = vpop.eup %3198  ;;  %v3967_v15 = vmul.f32 %v3197_v11, %v903_v61 }
 0x502   :  { %1214 = vrot.lane.b32.xlu1 %v3965_v13, %s3314_s6  ;;  %v3973_v16 = vmul.f32 %v3199_v14, %v902_v55  ;;  %v3201_v17 = vpop.eup %3200  ;;  %5190 = vst [vmem:[#allocation11_spill] sm:$0xff] %v4103_v52 }
 0x503   :  { %1218 = vrot.lane.b32.xlu0 %v3967_v15, %s3314_s6  ;;  %v3979_v18 = vmul.f32 %v3201_v17, %v904_v56  ;;  %v4112_v56 = vrot.slane %v2814_v44, %v4072_v34 }
 0x505   :  { %5191 = vst [vmem:[#allocation12_spill] sm:$0xff] %v4112_v56 }
 0x506   :  { %1216 = vrot.lane.b32.xlu1 %v3973_v16, %s3314_s6 }
 0x507   :  { %1174 = vrot.lane.b32.xlu0 %v3965_v13, %s3315_s7 }
 0x50a   :  { %1220 = vrot.lane.b32.xlu1 %v3979_v18, %s3314_s6 }
 0x50b   :  { %1178 = vrot.lane.b32.xlu0 %v3967_v15, %s3315_s7 }
 0x50e   :  { %1176 = vrot.lane.b32.xlu1 %v3973_v16, %s3315_s7 }
 0x50f   :  { %1134 = vrot.lane.b32.xlu0 %v3965_v13, %s3316_s22 }
 0x512   :  { %1180 = vrot.lane.b32.xlu1 %v3979_v18, %s3315_s7 }
 0x513   :  { %1138 = vrot.lane.b32.xlu0 %v3967_v15, %s3316_s22 }
 0x516   :  { %1136 = vrot.lane.b32.xlu1 %v3973_v16, %s3316_s22 }
 0x517   :  { %1094 = vrot.lane.b32.xlu0 %v3965_v13, %s3317_s2 }
 0x51a   :  { %1140 = vrot.lane.b32.xlu1 %v3979_v18, %s3316_s22 }
 0x51b   :  { %1098 = vrot.lane.b32.xlu0 %v3967_v15, %s3317_s2 }
 0x51e   :  { %1096 = vrot.lane.b32.xlu1 %v3973_v16, %s3317_s2 }
 0x51f   :  { %1054 = vrot.lane.b32.xlu0 %v3965_v13, %s3318_s23 }
 0x522   :  { %1100 = vrot.lane.b32.xlu1 %v3979_v18, %s3317_s2 }
 0x523   :  { %1058 = vrot.lane.b32.xlu0 %v3967_v15, %s3318_s23 }
 0x526   :  { %1056 = vrot.lane.b32.xlu1 %v3973_v16, %s3318_s23 }
 0x527   :  { %1014 = vrot.lane.b32.xlu0 %v3965_v13, %s3319_s24 }
 0x52a   :  { %1060 = vrot.lane.b32.xlu1 %v3979_v18, %s3318_s23 }
 0x52b   :  { %1018 = vrot.lane.b32.xlu0 %v3967_v15, %s3319_s24 }
 0x52e   :  { %1016 = vrot.lane.b32.xlu1 %v3973_v16, %s3319_s24 }
 0x52f   :  { %974 = vrot.lane.b32.xlu0 %v3965_v13, %s3320_s25 }
 0x532   :  { %1020 = vrot.lane.b32.xlu1 %v3979_v18, %s3319_s24 }
 0x533   :  { %978 = vrot.lane.b32.xlu0 %v3967_v15, %s3320_s25 }
 0x536   :  { %976 = vrot.lane.b32.xlu1 %v3973_v16, %s3320_s25 }
 0x537   :  { %933 = vrot.lane.b32.xlu0 %v3965_v13, %s3321_s3 }
 0x53a   :  { %980 = vrot.lane.b32.xlu1 %v3979_v18, %s3320_s25 }
 0x53b   :  { %937 = vrot.lane.b32.xlu0 %v3967_v15, %s3321_s3 }
 0x53e   :  { %935 = vrot.lane.b32.xlu1 %v3973_v16, %s3321_s3 }
 0x53f   :  { %1258 = vperm.xlu0 %3181, %v1255_v19  }
 0x542   :  { %939 = vrot.lane.b32.xlu1 %v3979_v18, %s3321_s3 }
 0x543   :  { %2150 = vperm.xlu0 %3181, %v2147_v20  }
 0x546   :  { %1412 = vperm.xlu1 %3182, %v1409_v21   ;;  %v4140_v21 = vrot.slane %v2813_v1, %v4072_v34 }
 0x547   :  { %2158 = vperm.xlu0 %3181, %v2155_v22   ;;  %v4143_v22 = vrot.slane %v2813_v1, %v4075_v35 }
 0x548   :  { %5195 = vst [vmem:[#allocation18_spill] sm:$0xff] %v4140_v21 }
 0x549   :  { %5196 = vst [vmem:[#allocation19_spill] sm:$0xff] %v4143_v22 }
 0x54a   :  { %1492 = vperm.xlu1 %3182, %v1489_v23   ;;  %v2812_v23 = vld [vmem:[%s5184_s26 + $0x5] ss:$8 sm:$0xf] }
 0x574   :  { %v1215_v30 = vpop.permute.xlu1 %1214 }
 0x575   :  { %v1219_v31 = vpop.permute.xlu0 %1218 }
 0x578   :  { %v1217_v36 = vpop.permute.xlu1 %1216 }
 0x579   :  { %v1224_v37 = vsel %vm1222_vm4, %v1217_v36, %v1219_v31  ;;  %v1225_v38 = vsel %vm1222_vm4, %v1215_v30, %v1217_v36  ;;  %v1175_v39 = vpop.permute.xlu0 %1174 }
 0x57a   :  { %v1250_v40 = vmul.f32 %v4066_v32, %v1225_v38  ;;  %v1251_v41 = vmul.f32 %v4069_v33, %v1224_v37  ;;  %v4156_v37 = vrot.slane %v2812_v23, %v4056_v27  ;;  %v4159_v38 = vrot.slane %v2812_v23, %v4059_v28  ;;  %v4656_v32 = vld [vmem:[%s5145_s20 + $0x110] sm:$0xff]  ;;  %v4662_v33 = vld [vmem:[%s5145_s20 + $0x8] sm:$0xff] }
 0x57b   :  { %5229 = vst [vmem:[#allocation50_spill] sm:$0xff] %v4656_v32  ;;  %5230 = vst [vmem:[#allocation51_spill] sm:$0xff] %v4662_v33 }
 0x57c   :  { %1279 = vmatprep.subr.mxu0 %v1251_v41  ;;  %v1221_v45 = vpop.permute.xlu1 %1220  ;;  %5197 = vst [vmem:[#allocation15_spill] sm:$0xff] %v4156_v37  ;;  %5198 = vst [vmem:[#allocation17_spill] sm:$0xff] %v4159_v38 }
 0x57d   :  { %v1179_v46 = vpop.permute.xlu0 %1178  ;;  %v1223_v47 = vsel %vm1222_vm4, %v1219_v31, %v1221_v45  ;;  %v1226_v48 = vsel %vm1222_vm4, %v1221_v45, %v1215_v30  ;;  %1280 = vmatpush1.msra.mxu0 %v1250_v40 }
 0x57e   :  { %v1252_v49 = vmul.f32 %v4084_v42, %v1223_v47  ;;  %v1253_v50 = vmul.f32 %v4087_v43, %v1226_v48  ;;  %v4168_v47 = vrot.slane %v2812_v23, %v4072_v34  ;;  %v4171_v48 = vrot.slane %v2812_v23, %v4075_v35  ;;  %v4644_v43 = vld [vmem:[%s5145_s20 + $0x190] sm:$0xff]  ;;  %v4650_v42 = vld [vmem:[%s5145_s20 + $0x88] sm:$0xff] }
 0x57f   :  { %5227 = vst [vmem:[#allocation48_spill] sm:$0xff] %v4644_v43  ;;  %5228 = vst [vmem:[#allocation49_spill] sm:$0xff] %v4650_v42 }
 0x580   :  { %1350 = vmatprep.subr.mxu1 %v1253_v50  ;;  %v1177_v61 = vpop.permute.xlu1 %1176  ;;  %5199 = vst [vmem:[#allocation20_spill] sm:$0xff] %v4168_v47  ;;  %5200 = vst [vmem:[#allocation22_spill] sm:$0xff] %v4171_v48 }
 0x581   :  { %v1135_v57 = vpop.permute.xlu0 %1134  ;;  %v1184_v62 = vsel %vm1182_vm5, %v1177_v61, %v1179_v46  ;;  %v1185_v59 = vsel %vm1182_vm5, %v1175_v39, %v1177_v61  ;;  %1351 = vmatpush1.msra.mxu1 %v1252_v49  ;;  %v2811_v49 = vld [vmem:[%s5184_s26 + $0x3] ss:$8 sm:$0xf] }
 0x582   :  { %v1210_v63 = vmul.f32 %v4100_v51, %v1185_v59  ;;  %v1211_v55 = vmul.f32 %v4103_v52, %v1184_v62  ;;  %v4632_v51 = vld [vmem:[%s5145_s20 + $0x118] sm:$0xff]  ;;  %v4638_v52 = vld [vmem:[%s5145_s20 + $0x10] sm:$0xff] }
 0x583   :  { %5225 = vst [vmem:[#allocation46_spill] sm:$0xff] %v4632_v51  ;;  %5226 = vst [vmem:[#allocation47_spill] sm:$0xff] %v4638_v52 }
 0x584   :  { %1281 = vmatprep.subr.mxu0 %v1211_v55  ;;  %v1181_v2 = vpop.permute.xlu1 %1180  ;;  %v4185_v55 = vrot.slane %v2811_v49, %v4059_v28 }
 0x585   :  { %v1139_v3 = vpop.permute.xlu0 %1138  ;;  %v1183_v4 = vsel %vm1182_vm5, %v1179_v46, %v1181_v2  ;;  %v1186_v5 = vsel %vm1182_vm5, %v1181_v2, %v1175_v39  ;;  %1282 = vmatpush1.msra.mxu0 %v1210_v63 }
 0x586   :  { %v1212_v6 = vmul.f32 %v4112_v56, %v1183_v4  ;;  %v1213_v7 = vmul.f32 %v4115_v58, %v1186_v5  ;;  %5201 = vst [vmem:[#allocation23_spill] sm:$0xff] %v4185_v55  ;;  %v4196_v5 = vrot.slane %v2811_v49, %v4075_v35  ;;  %v4620_v58 = vld [vmem:[%s5145_s20 + $0x198] sm:$0xff]  ;;  %v4626_v56 = vld [vmem:[%s5145_s20 + $0x90] sm:$0xff] }
 0x587   :  { %5223 = vst [vmem:[#allocation44_spill] sm:$0xff] %v4620_v58  ;;  %5224 = vst [vmem:[#allocation45_spill] sm:$0xff] %v4626_v56 }
 0x588   :  { %1352 = vmatprep.subr.mxu1 %v1213_v7  ;;  %v1137_v10 = vpop.permute.xlu1 %1136  ;;  %5203 = vst [vmem:[#allocation25_spill] sm:$0xff] %v4196_v5 }
 0x589   :  { %v1095_v11 = vpop.permute.xlu0 %1094  ;;  %v1144_v14 = vsel %vm1142_vm6, %v1137_v10, %v1139_v3  ;;  %v1145_v17 = vsel %vm1142_vm6, %v1135_v57, %v1137_v10  ;;  %1353 = vmatpush1.msra.mxu1 %v1212_v6  ;;  %v4199_v6 = vrot.slane %v2811_v49, %v4072_v34 }
 0x58a   :  { %v1170_v19 = vmul.f32 %v4128_v8, %v1145_v17  ;;  %v1171_v20 = vmul.f32 %v4131_v9, %v1144_v14  ;;  %v4608_v8 = vld [vmem:[%s5145_s20 + $0x120] sm:$0xff]  ;;  %v4614_v9 = vld [vmem:[%s5145_s20 + $0x18] sm:$0xff] }
 0x58b   :  { %5204 = vst [vmem:[#allocation26_spill] sm:$0xff] %v4199_v6  ;;  %5221 = vst [vmem:[#allocation42_spill] sm:$0xff] %v4608_v8 }
 0x58c   :  { %1283 = vmatprep.subr.mxu0 %v1171_v20  ;;  %v1141_v24 = vpop.permute.xlu1 %1140  ;;  %5222 = vst [vmem:[#allocation43_spill] sm:$0xff] %v4614_v9 }
 0x58d   :  { %v1099_v26 = vpop.permute.xlu0 %1098  ;;  %v1143_v29 = vsel %vm1142_vm6, %v1139_v3, %v1141_v24  ;;  %v1146_v30 = vsel %vm1142_vm6, %v1141_v24, %v1135_v57  ;;  %1284 = vmatpush1.msra.mxu0 %v1170_v19 }
 0x58e   :  { %v1172_v31 = vmul.f32 %v4140_v21, %v1143_v29  ;;  %v1173_v36 = vmul.f32 %v4143_v22, %v1146_v30  ;;  %v4596_v22 = vld [vmem:[%s5145_s20 + $0x1a0] sm:$0xff]  ;;  %v4602_v21 = vld [vmem:[%s5145_s20 + $0x98] sm:$0xff] }
 0x58f   :  { %5219 = vst [vmem:[#allocation40_spill] sm:$0xff] %v4596_v22  ;;  %5220 = vst [vmem:[#allocation41_spill] sm:$0xff] %v4602_v21 }
 0x590   :  { %1354 = vmatprep.subr.mxu1 %v1173_v36  ;;  %v1097_v39 = vpop.permute.xlu1 %1096 }
 0x591   :  { %v1055_v40 = vpop.permute.xlu0 %1054  ;;  %v1104_v41 = vsel %vm1102_vm7, %v1097_v39, %v1099_v26  ;;  %v1105_v44 = vsel %vm1102_vm7, %v1095_v11, %v1097_v39  ;;  %1355 = vmatpush1.msra.mxu1 %v1172_v31  ;;  %v2809_v39 = vld [vmem:[%s5184_s26 + $0x1] ss:$8 sm:$0xf] }
 0x592   :  { %v1130_v45 = vmul.f32 %v4156_v37, %v1105_v44  ;;  %v1131_v46 = vmul.f32 %v4159_v38, %v1104_v41  ;;  %v4584_v37 = vld [vmem:[%s5145_s20 + $0x128] sm:$0xff]  ;;  %v4590_v38 = vld [vmem:[%s5145_s20 + $0x20] sm:$0xff] }
 0x593   :  { %5218 = vst [vmem:[#allocation39_spill] sm:$0xff] %v4590_v38 }
 0x594   :  { %1285 = vmatprep.subr.mxu0 %v1131_v46  ;;  %v1101_v50 = vpop.permute.xlu1 %1100 }
 0x595   :  { %v1059_v61 = vpop.permute.xlu0 %1058  ;;  %v1103_v57 = vsel %vm1102_vm7, %v1099_v26, %v1101_v50  ;;  %v1106_v62 = vsel %vm1102_vm7, %v1101_v50, %v1095_v11  ;;  %1286 = vmatpush1.msra.mxu0 %v1130_v45  ;;  %v4243_v50 = vrot.slane %v2809_v39, %v4059_v28 }
 0x596   :  { %v1132_v59 = vmul.f32 %v4168_v47, %v1103_v57  ;;  %v1133_v63 = vmul.f32 %v4171_v48, %v1106_v62  ;;  %1287 = vmatprep.subr.mxu0 %v3973_v16  ;;  %v4193_v16 = vrot.slane %v2811_v49, %v4056_v27  ;;  %v4572_v48 = vld [vmem:[%s5145_s20 + $0x1a8] sm:$0xff]  ;;  %v4578_v47 = vld [vmem:[%s5145_s20 + $0xa0] sm:$0xff] }
 0x597   :  { %1288 = vmatpush1.msra.mxu0 %v3965_v13  ;;  %v2810_v13 = vld [vmem:[%s5184_s26 + $0x2] ss:$8 sm:$0xf]  ;;  %5209 = vst [vmem:[#allocation31_spill] sm:$0xff] %v4243_v50 }
 0x598   :  { %1356 = vmatprep.subr.mxu1 %v1133_v63  ;;  %v1057_v1 = vpop.permute.xlu1 %1056  ;;  %5202 = vst [vmem:[#allocation24_spill] sm:$0xff] %v4193_v16  ;;  %v4215_v19 = vrot.slane %v2810_v13, %v4059_v28  ;;  %v4222_v30 = vrot.slane %v2810_v13, %v4056_v27  ;;  %v4225_v31 = vrot.slane %v2810_v13, %v4075_v35 }
 0x599   :  { %v1015_v2 = vpop.permute.xlu0 %1014  ;;  %v1065_v3 = vsel %vm1062_vm8, %v1055_v40, %v1057_v1  ;;  %1357 = vmatpush1.msra.mxu1 %v1132_v59  ;;  %v1064_v7 = vsel %vm1062_vm8, %v1057_v1, %v1059_v61  ;;  %v4228_v36 = vrot.slane %v2810_v13, %v4072_v34  ;;  %v4250_v1 = vrot.slane %v2809_v39, %v4056_v27 }
 0x59a   :  { %v1091_v4 = vmul.f32 %v4185_v55, %v1065_v3  ;;  %1358 = vmatprep.subr.mxu1 %v3979_v18  ;;  %5205 = vst [vmem:[#allocation27_spill] sm:$0xff] %v4215_v19  ;;  %v1092_v20 = vmul.f32 %v4199_v6, %v1064_v7  ;;  %5206 = vst [vmem:[#allocation28_spill] sm:$0xff] %v4222_v30  ;;  %v4256_v3 = vrot.slane %v2809_v39, %v4072_v34  ;;  %v4548_v6 = vld [vmem:[%s5145_s20 + $0x1b0] sm:$0xff]  ;;  %v4566_v55 = vld [vmem:[%s5145_s20 + $0x28] sm:$0xff] }
 0x59b   :  { %1359 = vmatpush1.msra.mxu1 %v3967_v15  ;;  %5207 = vst [vmem:[#allocation29_spill] sm:$0xff] %v4225_v31  ;;  %5208 = vst [vmem:[#allocation30_spill] sm:$0xff] %v4228_v36 }
 0x59c   :  { %1289 = vmatprep.subr.mxu0 %v1091_v4  ;;  %v1061_v18 = vpop.permute.xlu1 %1060  ;;  %5210 = vst [vmem:[#allocation32_spill] sm:$0xff] %v4250_v1  ;;  %5212 = vst [vmem:[#allocation34_spill] sm:$0xff] %v4256_v3  ;;  %v948_v4 = vld [vmem:[%s5184_s26] ss:$8 sm:$0xf] }
 0x59d   :  { %v1019_v10 = vpop.permute.xlu0 %1018  ;;  %v1063_v11 = vsel %vm1062_vm8, %v1059_v61, %v1061_v18  ;;  %v1066_v14 = vsel %vm1062_vm8, %v1061_v18, %v1055_v40 }
 0x59e   :  { %v1090_v17 = vmul.f32 %v4193_v16, %v1066_v14  ;;  %v1093_v15 = vmul.f32 %v4196_v5, %v1063_v11  ;;  %v4554_v5 = vld [vmem:[%s5145_s20 + $0xa8] sm:$0xff]  ;;  %v4560_v16 = vld [vmem:[%s5145_s20 + $0x130] sm:$0xff] }
 0x5a0   :  { %1290 = vmatpush1.msra.mxu0 %v1090_v17  ;;  %1360 = vmatprep.subr.mxu1 %v1093_v15  ;;  %v1017_v23 = vpop.permute.xlu1 %1016  ;;  %v4271_v15 = vrot.slane %v948_v4, %v4059_v28  ;;  %v4284_v28 = vrot.slane %v948_v4, %v4072_v34  ;;  %v1254_v34 = vld [vmem:[%s5048_s8] sm:$0xff] }
 0x5a1   :  { %v975_v24 = vpop.permute.xlu0 %974  ;;  %v1025_v26 = vsel %vm1022_vm9, %v1015_v2, %v1017_v23  ;;  %1361 = vmatpush1.msra.mxu1 %v1092_v20  ;;  %v1024_v40 = vsel %vm1022_vm9, %v1017_v23, %v1019_v10 }
 0x5a2   :  { %v1051_v29 = vmul.f32 %v4215_v19, %v1025_v26  ;;  %v1052_v61 = vmul.f32 %v4228_v36, %v1024_v40  ;;  %5213 = vst [vmem:[#allocation35_spill] sm:$0xff] %v4271_v15  ;;  %5216 = vst [vmem:[#allocation38_spill] sm:$0xff] %v4284_v28  ;;  %v4524_v36 = vld [vmem:[%s5145_s20 + $0x1b8] sm:$0xff]  ;;  %v4542_v19 = vld [vmem:[%s5145_s20 + $0x30] sm:$0xff] }
 0x5a4   :  { %1291 = vmatprep.subr.mxu0 %v1051_v29  ;;  %v1021_v41 = vpop.permute.xlu1 %1020  ;;  %v4278_v29 = vrot.slane %v948_v4, %v4056_v27 }
 0x5a5   :  { %v1023_v44 = vsel %vm1022_vm9, %v1019_v10, %v1021_v41  ;;  %v1026_v45 = vsel %vm1022_vm9, %v1021_v41, %v1015_v2  ;;  %v979_v57 = vpop.permute.xlu0 %978  ;;  %v4253_v2 = vrot.slane %v2809_v39, %v4075_v35  ;;  %v4281_v39 = vrot.slane %v948_v4, %v4075_v35  ;;  %v4332_v4 = vld [vmem:[%s5145_s20 + $0x1f8] sm:$0xff] }
 0x5a6   :  { %v1050_v46 = vmul.f32 %v4222_v30, %v1026_v45  ;;  %v1053_v49 = vmul.f32 %v4225_v31, %v1023_v44  ;;  %5214 = vst [vmem:[#allocation36_spill] sm:$0xff] %v4278_v29  ;;  %v4530_v31 = vld [vmem:[%s5145_s20 + $0xb0] sm:$0xff]  ;;  %v4536_v30 = vld [vmem:[%s5145_s20 + $0x138] sm:$0xff] }
 0x5a7   :  { %5211 = vst [vmem:[#allocation33_spill] sm:$0xff] %v4253_v2  ;;  %5215 = vst [vmem:[#allocation37_spill] sm:$0xff] %v4281_v39 }
 0x5a8   :  { %1292 = vmatpush1.msra.mxu0 %v1050_v46  ;;  %1362 = vmatprep.subr.mxu1 %v1053_v49  ;;  %v977_v62 = vpop.permute.xlu1 %976 }
 0x5a9   :  { %v985_v59 = vsel %vm982_vm10, %v975_v24, %v977_v62  ;;  %1363 = vmatpush1.msra.mxu1 %v1052_v61  ;;  %v984_v13 = vsel %vm982_vm10, %v977_v62, %v979_v57  ;;  %v934_v18 = vpop.permute.xlu0 %933  ;;  %v1407_v61 = vld [vmem:[%s5217_s4] sm:$0xff] }
 0x5aa   :  { %v1011_v63 = vmul.f32 %v4243_v50, %v985_v59  ;;  %v1012_v20 = vmul.f32 %v4256_v3, %v984_v13  ;;  %v1488_v62 = vld [vmem:[%s5052_s12] sm:$0xff]  ;;  %v4320_v59 = vld [vmem:[%s5145_s20 + $0xf8] sm:$0xff]  ;;  %v4338_v13 = vld [vmem:[%s5145_s20 + $0xf0] sm:$0xff] }
 0x5ab   :  { %v4500_v3 = vld [vmem:[%s5145_s20 + $0x1c0] sm:$0xff]  ;;  %v4518_v50 = vld [vmem:[%s5145_s20 + $0x38] sm:$0xff] }
 0x5ac   :  { %1293 = vmatprep.subr.mxu0 %v1011_v63  ;;  %v981_v7 = vpop.permute.xlu1 %980  ;;  %v4326_v63 = vld [vmem:[%s5145_s20 + $0x78] sm:$0xff] }
 0x5ad   :  { %v983_v10 = vsel %vm982_vm10, %v979_v57, %v981_v7  ;;  %v986_v11 = vsel %vm982_vm10, %v981_v7, %v975_v24  ;;  %v938_v40 = vpop.permute.xlu0 %937  ;;  %v1408_v57 = vld [vmem:[%s5050_s10] sm:$0xff]  ;;  %v4344_v7 = vld [vmem:[%s5145_s20 + $0x178] sm:$0xff] }
 0x5ae   :  { %v1010_v14 = vmul.f32 %v4250_v1, %v986_v11  ;;  %v1013_v17 = vmul.f32 %v4253_v2, %v983_v10  ;;  %v4356_v10 = vld [vmem:[%s5145_s20 + $0x1f0] sm:$0xff]  ;;  %v4362_v11 = vld [vmem:[%s5145_s20 + $0xe8] sm:$0xff]  ;;  %v4506_v2 = vld [vmem:[%s5145_s20 + $0xb8] sm:$0xff] }
 0x5af   :  { %v4512_v1 = vld [vmem:[%s5145_s20 + $0x140] sm:$0xff] }
 0x5b0   :  { %1294 = vmatpush1.msra.mxu0 %v1010_v14  ;;  %1364 = vmatprep.subr.mxu1 %v1013_v17  ;;  %v936_v23 = vpop.permute.xlu1 %935  ;;  %v4368_v14 = vld [vmem:[%s5145_s20 + $0x170] sm:$0xff]  ;;  %v4374_v17 = vld [vmem:[%s5145_s20 + $0x68] sm:$0xff] }
 0x5b1   :  { %v946_v26 = vsel %vm943_vm11, %v934_v18, %v936_v23  ;;  %1365 = vmatpush1.msra.mxu1 %v1012_v20  ;;  %v945_v41 = vsel %vm943_vm11, %v936_v23, %v938_v40  ;;  %v4380_v20 = vld [vmem:[%s5145_s20 + $0x1e8] sm:$0xff]  ;;  %v4386_v23 = vld [vmem:[%s5145_s20 + $0xe0] sm:$0xff] }
 0x5b2   :  { %v971_v24 = vmul.f32 %v4271_v15, %v946_v26  ;;  %v972_v49 = vmul.f32 %v4284_v28, %v945_v41  ;;  %v4392_v26 = vld [vmem:[%s5145_s20 + $0x168] sm:$0xff]  ;;  %v4410_v41 = vld [vmem:[%s5145_s20 + $0xd8] sm:$0xff]  ;;  %v4494_v15 = vld [vmem:[%s5145_s20 + $0x40] sm:$0xff] }
 0x5b3   :  { %v4476_v28 = vld [vmem:[%s5145_s20 + $0x1c8] sm:$0xff] }
 0x5b4   :  { %1295 = vmatprep.subr.mxu0 %v971_v24  ;;  %v940_v44 = vpop.permute.xlu1 %939  ;;  %v4398_v24 = vld [vmem:[%s5145_s20 + $0x60] sm:$0xff] }
 0x5b5   :  { %v944_v45 = vsel %vm943_vm11, %v938_v40, %v940_v44  ;;  %v947_v46 = vsel %vm943_vm11, %v940_v44, %v934_v18  ;;  %v4350_v18 = vld [vmem:[%s5145_s20 + $0x70] sm:$0xff]  ;;  %v4404_v40 = vld [vmem:[%s5145_s20 + $0x1e0] sm:$0xff] }
 0x5b6   :  { %v970_v27 = vmul.f32 %v4278_v29, %v947_v46  ;;  %v973_v35 = vmul.f32 %v4281_v39, %v944_v45  ;;  %v4416_v44 = vld [vmem:[%s5145_s20 + $0x160] sm:$0xff]  ;;  %v4422_v45 = vld [vmem:[%s5145_s20 + $0x58] sm:$0xff]  ;;  %v4488_v29 = vld [vmem:[%s5145_s20 + $0x148] sm:$0xff] }
 0x5b7   :  { %v4428_v46 = vld [vmem:[%s5145_s20 + $0x1d8] sm:$0xff]  ;;  %v4482_v39 = vld [vmem:[%s5145_s20 + $0xc0] sm:$0xff] }
 0x5b8   :  { %1296 = vmatpush1.msra.mxu0 %v970_v27  ;;  %1366 = vmatprep.subr.mxu1 %v973_v35  ;;  %v4434_v27 = vld [vmem:[%s5145_s20 + $0xd0] sm:$0xff]  ;;  %v4440_v35 = vld [vmem:[%s5145_s20 + $0x158] sm:$0xff] }
 0x5b9   :  { %2816 = vmatmul.mubr.msk.f32.vlgmr.msra.gmra.mxu0 %vm1261_vm12, %v1254_v34  ;;  %1367 = vmatpush1.msra.mxu1 %v972_v49  ;;  %v4452_v49 = vld [vmem:[%s5145_s20 + $0x1d0] sm:$0xff] }
 0x5ba   :  { %2817 = vmatmul.mubr.msk.f32.vlgmr.msra.gmra.mxu1 %vm1261_vm12, %v1254_v34  ;;  %3148 = vmatprep.subr.mxu0 %v5164_v0  ;;  %v4446_v34 = vld [vmem:[%s5145_s20 + $0x50] sm:$0xff] }
 0x5bb   :  { %3149 = vmatpush3.msra.mxu0 %v1407_v61  ;;  %3150 = vmatprep.mubr.msk.f32.mxu0 %vm3311_vm0, %v5164_v0 }
 0x5bc   :  { %3153 = vmatprep.subr.mxu1 %v5164_v0  ;;  %3155 = vmatprep.mubr.msk.f32.mxu1 %vm3311_vm0, %v5164_v0 }
 0x5bd   :  { %3151 = vmatmul.mubr.msk.f32.vlgmr.msra.gmra.mxu0 %vm273_vm2, %v1408_v57  ;;  %3154 = vmatpush3.msra.mxu1 %v1407_v61  ;;  %v4458_v61 = vld [vmem:[%s5145_s20 + $0xc8] sm:$0xff]  ;;  %v4464_v57 = vld [vmem:[%s5145_s20 + $0x150] sm:$0xff] }
 0x5be   :  { %3156 = vmatmul.mubr.msk.f32.vlgmr.msra.gmra.mxu1 %vm273_vm2, %v1488_v62  ;;  %2994 = vmatprep.subr.mxu0 %v4320_v59  ;;  %v4470_v62 = vld [vmem:[%s5145_s20 + $0x48] sm:$0xff] }
 0x5bf   :  { %2995 = vmatpush3.msra.mxu0 %v4326_v63  ;;  %3029 = vmatprep.subr.mxu1 %v4332_v4 }
 0x5c0   :  { %2996 = vmatprep.subr.mxu0 %v4338_v13  ;;  %3030 = vmatpush3.msra.mxu1 %v4344_v7 }
 0x5c1   :  { %2997 = vmatpush3.msra.mxu0 %v4350_v18  ;;  %3031 = vmatprep.subr.mxu1 %v4356_v10 }
 0x5c2   :  { %2998 = vmatprep.subr.mxu0 %v4362_v11  ;;  %3032 = vmatpush3.msra.mxu1 %v4368_v14 }
 0x5c3   :  { %2999 = vmatpush3.msra.mxu0 %v4374_v17  ;;  %3033 = vmatprep.subr.mxu1 %v4380_v20 }
 0x5c4   :  { %3000 = vmatprep.subr.mxu0 %v4386_v23  ;;  %3034 = vmatpush3.msra.mxu1 %v4392_v26 }
 0x5c5   :  { %3001 = vmatpush3.msra.mxu0 %v4398_v24  ;;  %3035 = vmatprep.subr.mxu1 %v4404_v40 }
 0x5c6   :  { %3002 = vmatprep.subr.mxu0 %v4410_v41  ;;  %3036 = vmatpush3.msra.mxu1 %v4416_v44 }
 0x5c7   :  { %3003 = vmatpush3.msra.mxu0 %v4422_v45  ;;  %3037 = vmatprep.subr.mxu1 %v4428_v46 }
 0x5c8   :  { %3004 = vmatprep.subr.mxu0 %v4434_v27  ;;  %3038 = vmatpush3.msra.mxu1 %v4440_v35 }
 0x5c9   :  { %3005 = vmatpush3.msra.mxu0 %v4446_v34  ;;  %3039 = vmatprep.subr.mxu1 %v4452_v49 }
 0x5ca   :  { %3006 = vmatprep.subr.mxu0 %v4458_v61  ;;  %3040 = vmatpush3.msra.mxu1 %v4464_v57 }
 0x5cb   :  { %3007 = vmatpush3.msra.mxu0 %v4470_v62  ;;  %3041 = vmatprep.subr.mxu1 %v4476_v28 }
 0x5cc   :  { %3008 = vmatprep.subr.mxu0 %v4482_v39  ;;  %3042 = vmatpush3.msra.mxu1 %v4488_v29 }
 0x5cd   :  { %3009 = vmatpush3.msra.mxu0 %v4494_v15  ;;  %3043 = vmatprep.subr.mxu1 %v4500_v3 }
 0x5ce   :  { %3010 = vmatprep.subr.mxu0 %v4506_v2  ;;  %3044 = vmatpush3.msra.mxu1 %v4512_v1 }
 0x5cf   :  { %3011 = vmatpush3.msra.mxu0 %v4518_v50  ;;  %3045 = vmatprep.subr.mxu1 %v4524_v36 }
 0x5d0   :  { %3012 = vmatprep.subr.mxu0 %v4530_v31  ;;  %3046 = vmatpush3.msra.mxu1 %v4536_v30 }
 0x5d1   :  { %3013 = vmatpush3.msra.mxu0 %v4542_v19  ;;  %3047 = vmatprep.subr.mxu1 %v4548_v6 }
 0x5d2   :  { %3014 = vmatprep.subr.mxu0 %v4554_v5  ;;  %3048 = vmatpush3.msra.mxu1 %v4560_v16 }
 0x5d3   :  { %3015 = vmatpush3.msra.mxu0 %v4566_v55  ;;  %3049 = vmatprep.subr.mxu1 %v4572_v48 }
 0x5d4   :  { %3016 = vmatprep.subr.mxu0 %v4578_v47  ;;  %3050 = vmatpush3.msra.mxu1 %v4584_v37 }
 0x5d5   :  { %3017 = vmatpush3.msra.mxu0 %v4590_v38  ;;  %3051 = vmatprep.subr.mxu1 %v4596_v22 }
 0x5d6   :  { %3018 = vmatprep.subr.mxu0 %v4602_v21  ;;  %3052 = vmatpush3.msra.mxu1 %v4608_v8 }
 0x5d7   :  { %3019 = vmatpush3.msra.mxu0 %v4614_v9  ;;  %3053 = vmatprep.subr.mxu1 %v4620_v58 }
 0x5d8   :  { %3020 = vmatprep.subr.mxu0 %v4626_v56  ;;  %3054 = vmatpush3.msra.mxu1 %v4632_v51 }
 0x5d9   :  { %3021 = vmatpush3.msra.mxu0 %v4638_v52  ;;  %3055 = vmatprep.subr.mxu1 %v4644_v43 }
 0x5da   :  { %3022 = vmatprep.subr.mxu0 %v4650_v42  ;;  %3056 = vmatpush3.msra.mxu1 %v4656_v32  ;;  %v4674_v42 = vld [vmem:[%s5145_s20 + $0x80] sm:$0xff]  ;;  %v4680_v32 = vld [vmem:[%s5145_s20 + $0x108] sm:$0xff] }
 0x5db   :  { %3023 = vmatpush3.msra.mxu0 %v4662_v33  ;;  %3057 = vmatprep.subr.mxu1 %v4668_v25  ;;  %5232 = vst [vmem:[#allocation53_spill] sm:$0xff] %v4674_v42  ;;  %5233 = vst [vmem:[#allocation54_spill] sm:$0xff] %v4680_v32  ;;  %v4686_v33 = vld [vmem:[%s5145_s20] sm:$0xff] }
 0x5dc   :  { %3024 = vmatprep.subr.mxu0 %v4674_v42  ;;  %3058 = vmatpush3.msra.mxu1 %v4680_v32  ;;  %5234 = vst [vmem:[#allocation55_spill] sm:$0xff] %v4686_v33  ;;  %v4692_v25 = vld [vmem:[%s5145_s20 + $0x180] sm:$0xff]  ;;  %v1413_v32 = vpop.permute.xlu1 %1412 }
 0x5dd   :  { %3025 = vmatpush3.msra.mxu0 %v4686_v33  ;;  %5235 = vst [vmem:[#allocation56_spill] sm:$0xff] %v4692_v25  ;;  %3059 = vmatprep.subr.mxu1 %v4692_v25  ;;  %v4698_v42 = vld [vmem:[%s5145_s20 + $0x100] sm:$0xff]  ;;  %v1259_v33 = vpop.permute.xlu0 %1258 }
 0x5de   :  { %5236 = vst [vmem:[#allocation57_spill] sm:$0xff] %v4698_v42  ;;  %3060 = vmatpush3.msra.mxu1 %v4698_v42  ;;  %3158 = vmatprep.subr.mxu0 %v5164_v0 }
 0x5df   :  { %2821 = vmatprep.subr.msk.mxu1 %vm369_vm1, %v5176_v12 }
 0x5e0   :  { %v1493_v8 = vpop.permute.xlu1 %1492 }
 0x5e1   :  { %v4704_v56 = vpop.permute.xlu0 %2150 }
 0x5e2   :  { %5237 = vst [vmem:[#allocation58_spill] sm:$0xff] %v4704_v56 }
 0x679   :  { %v1331_v52 = vpop.f32.mrf.mxu0 }
 0x67a   :  { %v1402_v43 = vpop.f32.mrf.mxu1  ;;  %v4708_v58 = vadd.f32 %v1331_v52, %v1259_v33 }
 0x67b   :  { %v1333_v51 = vpop.f32.mrf.mxu0  ;;  %v4712_v38 = vadd.f32 %v1402_v43, %v1259_v33 }
 0x67c   :  { %v4706_v25 = vadd.f32 %v1333_v51, %v1259_v33  ;;  %v1404_v9 = vpop.f32.mrf.mxu1 }
 0x67d   :  { %v4710_v21 = vadd.f32 %v1404_v9, %v1259_v33  ;;  %v1484_v42 = vpop.f32.mrf.mxu0  ;;  %v2159_v33 = vpop.permute.xlu0 %2158 }
 0x67e   :  { %5238 = vst [vmem:[#allocation59_spill] sm:$0xff] %v4706_v25  ;;  %v1485_v22 = vadd.f32 %v1484_v42, %v1413_v32  ;;  %1633 = vmatprep.mubr.f32.mxu0 %v4706_v25  ;;  %v1564_v12 = vpop.f32.mrf.mxu1  ;;  %v4732_v25 = vld [vmem:[%s5054_s14] sm:$0xff] }
 0x67f   :  { %5239 = vst [vmem:[#allocation60_spill] sm:$0xff] %v4710_v21  ;;  %1634 = vmatmul.mubr.f32.vlgmr.msra.gmra.mxu0 %v4708_v58  ;;  %1703 = vmatprep.mubr.f32.mxu1 %v4710_v21  ;;  %v3152_v56 = vpop.f32.mrf.mxu0  ;;  %v1565_v52 = vadd.f32 %v1564_v12, %v1493_v8 }
 0x680   :  { %v4717_v51 = vadd.f32 1.0, %v1485_v22  ;;  %1704 = vmatmul.mubr.f32.vlgmr.msra.gmra.mxu1 %v4712_v38  ;;  %v3157_v9 = vpop.f32.mrf.mxu1  ;;  %3160 = vmatprep.mubr.msk.f32.mxu0 %vm3311_vm0, %v5164_v0 }
 0x681   :  { %2822 = vmatpush1.msk.msra.mxu1 %vm369_vm1, %v3842_v54  ;;  %1849 = vmatprep.mubr.f32.mxu1 %v5164_v0 }
 0x682   :  { %v2161_v32 = vmul.f32 %v2159_v33, %v4717_v51  ;;  %3066 = vmatprep.subr.mxu1 %v4320_v59 }
 0x684   :  { %v4727_v42 = vadd.f32 %v2161_v32, %v1565_v52 }
 0x73f   :  { %v3026_v43 = vpop.f32.mrf.mxu0 }
 0x740   :  { %v3061_v56 = vpop.f32.mrf.mxu1 }
 0x741   :  { %v3027_v22 = vpop.f32.mrf.mxu0 }
 0x742   :  { %v3028_v12 = vadd.f32 %v3027_v22, %v3026_v43  ;;  %v3062_v8 = vpop.f32.mrf.mxu1 }
 0x743   :  { %v3063_v9 = vadd.f32 %v3062_v8, %v3061_v56 }
 0x745   :  { %v1706_v21 = vadd.f32 %v3063_v9, %v3028_v12 }
 0x747   :  { %3159 = vmatpush3.msra.mxu0 %v1706_v21  ;;  %v5240_v21 = vld [vmem:[#allocation40_spill] sm:$0xff] }
 0x748   :  { %3161 = vmatmul.mubr.msk.f32.vlgmr.msra.gmra.mxu0 %vm273_vm2, %v4732_v25  ;;  %2824 = vmatprep.subr.msk.mxu0 %vm369_vm1, %v3857_v60 }
 0x749   :  { %2825 = vmatpush1.msk.msra.mxu0 %vm369_vm1, %v3844_v53  ;;  %1920 = vmatprep.mubr.f32.mxu0 %v5164_v0 }
 0x74a   :  { %3101 = vmatprep.subr.mxu0 %v4332_v4 }
 0x808   :  { %v1778_v59 = vpop.f32.mrf.mxu0 }
 0x809   :  { %2823 = vmatmul.mubr.msk.f32.vlgmr.msra.gmra.mxu1 %vm365_vm3, %v1778_v59  ;;  %2826 = vmatmul.mubr.msk.f32.vlgmr.msra.gmra.mxu0 %vm365_vm3, %v1778_v59 }
 0x80a   :  { %v3162_v52 = vpop.f32.mrf.mxu0  ;;  %3067 = vmatpush3.msra.mxu1 %v4326_v63  ;;  %3102 = vmatpush3.msra.mxu0 %v4344_v7 }
 0x80b   :  { %3068 = vmatprep.subr.mxu1 %v4338_v13  ;;  %3103 = vmatprep.subr.mxu0 %v4356_v10 }
 0x80c   :  { %3069 = vmatpush3.msra.mxu1 %v4350_v18  ;;  %3104 = vmatpush3.msra.mxu0 %v4368_v14 }
 0x80d   :  { %3070 = vmatprep.subr.mxu1 %v4362_v11  ;;  %3105 = vmatprep.subr.mxu0 %v4380_v20  ;;  %v5260_v11 = vld [vmem:[#allocation59_spill] sm:$0xff] }
 0x80e   :  { %3071 = vmatpush3.msra.mxu1 %v4374_v17  ;;  %3106 = vmatpush3.msra.mxu0 %v4392_v26  ;;  %v5261_v17 = vld [vmem:[#allocation60_spill] sm:$0xff] }
 0x80f   :  { %3072 = vmatprep.subr.mxu1 %v4386_v23  ;;  %3107 = vmatprep.subr.mxu0 %v4404_v40 }
 0x810   :  { %3073 = vmatpush3.msra.mxu1 %v4398_v24  ;;  %3108 = vmatpush3.msra.mxu0 %v4416_v44 }
 0x811   :  { %3074 = vmatprep.subr.mxu1 %v4410_v41  ;;  %3109 = vmatprep.subr.mxu0 %v4428_v46 }
 0x812   :  { %3075 = vmatpush3.msra.mxu1 %v4422_v45  ;;  %3110 = vmatpush3.msra.mxu0 %v4440_v35 }
 0x813   :  { %3076 = vmatprep.subr.mxu1 %v4434_v27  ;;  %3111 = vmatprep.subr.mxu0 %v4452_v49 }
 0x814   :  { %3077 = vmatpush3.msra.mxu1 %v4446_v34  ;;  %3112 = vmatpush3.msra.mxu0 %v4464_v57  ;;  %v5262_v57 = vld [vmem:[#allocation58_spill] sm:$0xff] }
 0x815   :  { %3078 = vmatprep.subr.mxu1 %v4458_v61  ;;  %3113 = vmatprep.subr.mxu0 %v4476_v28  ;;  %v5259_v28 = vld [vmem:[#allocation21_spill] sm:$0xff] }
 0x816   :  { %3079 = vmatpush3.msra.mxu1 %v4470_v62  ;;  %3114 = vmatpush3.msra.mxu0 %v4488_v29  ;;  %v5257_v29 = vld [vmem:[#allocation55_spill] sm:$0xff] }
 0x817   :  { %3080 = vmatprep.subr.mxu1 %v4482_v39  ;;  %3115 = vmatprep.subr.mxu0 %v4500_v3  ;;  %v5255_v3 = vld [vmem:[#allocation53_spill] sm:$0xff] }
 0x818   :  { %3081 = vmatpush3.msra.mxu1 %v4494_v15  ;;  %3116 = vmatpush3.msra.mxu0 %v4512_v1  ;;  %v5253_v1 = vld [vmem:[#allocation51_spill] sm:$0xff]  ;;  %v5256_v15 = vld [vmem:[#allocation56_spill] sm:$0xff]  ;;  %v5258_v39 = vld [vmem:[#allocation57_spill] sm:$0xff] }
 0x819   :  { %3082 = vmatprep.subr.mxu1 %v4506_v2  ;;  %3117 = vmatprep.subr.mxu0 %v4524_v36  ;;  %v5251_v36 = vld [vmem:[#allocation49_spill] sm:$0xff]  ;;  %v5254_v2 = vld [vmem:[#allocation54_spill] sm:$0xff] }
 0x81a   :  { %3083 = vmatpush3.msra.mxu1 %v4518_v50  ;;  %3118 = vmatpush3.msra.mxu0 %v4536_v30  ;;  %v5241_v30 = vld [vmem:[#allocation39_spill] sm:$0xff]  ;;  %v5252_v50 = vld [vmem:[#allocation52_spill] sm:$0xff] }
 0x81b   :  { %3084 = vmatprep.subr.mxu1 %v4530_v31  ;;  %3119 = vmatprep.subr.mxu0 %v4548_v6  ;;  %v5242_v31 = vld [vmem:[#allocation42_spill] sm:$0xff]  ;;  %v5243_v6 = vld [vmem:[#allocation41_spill] sm:$0xff] }
 0x81c   :  { %3085 = vmatpush3.msra.mxu1 %v4542_v19  ;;  %3120 = vmatpush3.msra.mxu0 %v4560_v16  ;;  %v5244_v19 = vld [vmem:[#allocation44_spill] sm:$0xff]  ;;  %v5245_v16 = vld [vmem:[#allocation43_spill] sm:$0xff] }
 0x81d   :  { %3086 = vmatprep.subr.mxu1 %v4554_v5  ;;  %3121 = vmatprep.subr.mxu0 %v4572_v48  ;;  %v5246_v5 = vld [vmem:[#allocation46_spill] sm:$0xff]  ;;  %v5247_v48 = vld [vmem:[#allocation45_spill] sm:$0xff] }
 0x81e   :  { %3087 = vmatpush3.msra.mxu1 %v4566_v55  ;;  %3122 = vmatpush3.msra.mxu0 %v4584_v37  ;;  %v5248_v55 = vld [vmem:[#allocation48_spill] sm:$0xff]  ;;  %v5249_v37 = vld [vmem:[#allocation47_spill] sm:$0xff] }
 0x81f   :  { %3088 = vmatprep.subr.mxu1 %v4578_v47  ;;  %3123 = vmatprep.subr.mxu0 %v5240_v21  ;;  %v5250_v47 = vld [vmem:[#allocation50_spill] sm:$0xff] }
 0x820   :  { %3089 = vmatpush3.msra.mxu1 %v5241_v30  ;;  %3124 = vmatpush3.msra.mxu0 %v5242_v31 }
 0x821   :  { %3090 = vmatprep.subr.mxu1 %v5243_v6  ;;  %3125 = vmatprep.subr.mxu0 %v5244_v19 }
 0x822   :  { %3091 = vmatpush3.msra.mxu1 %v5245_v16  ;;  %3126 = vmatpush3.msra.mxu0 %v5246_v5 }
 0x823   :  { %3092 = vmatprep.subr.mxu1 %v5247_v48  ;;  %3127 = vmatprep.subr.mxu0 %v5248_v55 }
 0x824   :  { %3093 = vmatpush3.msra.mxu1 %v5249_v37  ;;  %3128 = vmatpush3.msra.mxu0 %v5250_v47 }
 0x825   :  { %3094 = vmatprep.subr.mxu1 %v5251_v36  ;;  %3129 = vmatprep.subr.mxu0 %v5252_v50 }
 0x826   :  { %3095 = vmatpush3.msra.mxu1 %v5253_v1  ;;  %3130 = vmatpush3.msra.mxu0 %v5254_v2 }
 0x827   :  { %3096 = vmatprep.subr.mxu1 %v5255_v3  ;;  %3131 = vmatprep.subr.mxu0 %v5256_v15 }
 0x828   :  { %3097 = vmatpush3.msra.mxu1 %v5257_v29  ;;  %3132 = vmatpush3.msra.mxu0 %v5258_v39 }
 0x829   :  { %3163 = vmatprep.subr.mxu1 %v5164_v0  ;;  %2828 = vmatprep.subr.msk.mxu0 %vm369_vm1, %v5259_v28 }
 0x8c9   :  { %v1851_v63 = vpop.f32.mrf.mxu1  ;;  %v1922_v4 = vpop.f32.mrf.mxu0 }
 0x8ca   :  { %v1927_v13 = vsub.f32 %v4708_v58, %v1851_v63  ;;  %v1929_v7 = vsub.f32 %v4712_v38, %v1922_v4  ;;  %v2618_v63 = vld [vmem:[%s5058_s18] sm:$0xff] }
 0x8cb   :  { %v1853_v18 = vpop.f32.mrf.mxu1  ;;  %v1924_v10 = vpop.f32.mrf.mxu0 }
 0x8cc   :  { %v1928_v14 = vsub.f32 %v5260_v11, %v1853_v18  ;;  %v1930_v20 = vsub.f32 %v5261_v17, %v1924_v10  ;;  %v1931_v24 = vmul.f32 %v1927_v13, %v1927_v13  ;;  %v1933_v40 = vmul.f32 %v1929_v7, %v1929_v7 }
 0x8ce   :  { %v1932_v23 = vmul.f32 %v1928_v14, %v1928_v14  ;;  %v1934_v26 = vmul.f32 %v1930_v20, %v1930_v20 }
 0x8d0   :  { %1999 = vmatprep.mubr.f32.mxu1 %v1932_v23  ;;  %2069 = vmatprep.mubr.f32.mxu0 %v1934_v26  ;;  %v5265_v23 = vld [vmem:[#allocation6_spill] sm:$0xff] }
 0x8d1   :  { %2000 = vmatmul.mubr.f32.vlgmr.msra.gmra.mxu1 %v1931_v24  ;;  %2070 = vmatmul.mubr.f32.vlgmr.msra.gmra.mxu0 %v1933_v40 }
 0x8d2   :  { %3165 = vmatprep.mubr.msk.f32.mxu1 %vm3311_vm0, %v5164_v0  ;;  %2829 = vmatpush1.msk.msra.mxu0 %vm369_vm1, %v3842_v54 }
 0x8d3   :  { %2230 = vmatprep.mubr.f32.mxu0 %v5164_v0  ;;  %2834 = vmatprep.subr.msk.mxu0 %vm369_vm1, %v5259_v28 }
 0x991   :  { %v3098_v58 = vpop.f32.mrf.mxu1  ;;  %v3133_v38 = vpop.f32.mrf.mxu0 }
 0x993   :  { %v3099_v41 = vpop.f32.mrf.mxu1  ;;  %v3134_v44 = vpop.f32.mrf.mxu0 }
 0x994   :  { %v3100_v45 = vadd.f32 %v3099_v41, %v3098_v58  ;;  %v3135_v46 = vadd.f32 %v3134_v44, %v3133_v38  ;;  %v5266_v58 = vld [vmem:[#allocation8_spill] sm:$0xff]  ;;  %v5267_v41 = vld [vmem:[#allocation9_spill] sm:$0xff] }
 0x996   :  { %v2072_v27 = vadd.f32 %v3135_v46, %v3100_v45 }
 0x998   :  { %3164 = vmatpush3.msra.mxu1 %v2072_v27 }
 0x999   :  { %3166 = vmatmul.mubr.msk.f32.vlgmr.msra.gmra.mxu1 %vm273_vm2, %v4732_v25  ;;  %2831 = vmatprep.subr.msk.mxu1 %vm369_vm1, %v3857_v60 }
 0x99a   :  { %2832 = vmatpush1.msk.msra.mxu1 %vm369_vm1, %v3844_v53  ;;  %2301 = vmatprep.mubr.f32.mxu1 %v5164_v0 }
 0x99b   :  { %2837 = vmatprep.subr.msk.mxu1 %vm369_vm1, %v3857_v60 }
 0xa59   :  { %v2141_v35 = vpop.f32.mrf.mxu1 }
 0xa5a   :  { %v2142_v34 = vadd.f32 1e-05, %v2141_v35 }
 0xa5b   :  { %v3167_v49 = vpop.f32.mrf.mxu1 }
 0xa5c   :  { %3202 = vrsqrt.f32 %v2142_v34  ;;  %v5268_v49 = vld [vmem:[#allocation11_spill] sm:$0xff] }
 0xa69   :  { %v3203_v61 = vpop.eup %3202 }
 0xa6a   :  { %v2153_v62 = vmul.f32 %v3203_v61, %v5262_v57 }
 0xa6c   :  { %v2154_v25 = vmul.f32 %v2153_v62, %v4717_v51  ;;  %v5269_v62 = vld [vmem:[#allocation10_spill] sm:$0xff] }
 0xa6e   :  { %2830 = vmatmul.mubr.msk.f32.vlgmr.msra.gmra.mxu0 %vm365_vm3, %v2154_v25  ;;  %2833 = vmatmul.mubr.msk.f32.vlgmr.msra.gmra.mxu1 %vm365_vm3, %v2154_v25 }
 0xa6f   :  { %2835 = vmatpush1.msk.msra.mxu0 %vm369_vm1, %v3842_v54  ;;  %2379 = vmatprep.mubr.f32.mxu0 %v5164_v0 }
 0xa70   :  { %2838 = vmatpush1.msk.msra.mxu1 %vm369_vm1, %v3844_v53  ;;  %2450 = vmatprep.mubr.f32.mxu1 %v5164_v0 }
 0xa72   :  { %2836 = vmatmul.mubr.msk.f32.vlgmr.msra.gmra.mxu0 %vm365_vm3, %v4727_v42  ;;  %2839 = vmatmul.mubr.msk.f32.vlgmr.msra.gmra.mxu1 %vm365_vm3, %v4727_v42 }
 0xa73   :  { %2691 = vmatprep.mubr.f32.mxu0 %v5164_v0  ;;  %2762 = vmatprep.mubr.f32.mxu1 %v5164_v0 }
 0xb2e   :  { %v2232_v60 = vpop.f32.mrf.mxu0  ;;  %v2303_v51 = vpop.f32.mrf.mxu1 }
 0xb2f   :  { %v2308_v32 = vmul.f32 %v2232_v60, %v1927_v13  ;;  %v2310_v43 = vmul.f32 %v2303_v51, %v1929_v7 }
 0xb30   :  { %v2234_v54 = vpop.f32.mrf.mxu0  ;;  %v2305_v33 = vpop.f32.mrf.mxu1 }
 0xb31   :  { %v2309_v22 = vmul.f32 %v2234_v54, %v1928_v14  ;;  %v2311_v12 = vmul.f32 %v2305_v33, %v1930_v20  ;;  %v5264_v14 = vld [vmem:[#allocation7_spill] sm:$0xff]  ;;  %v5270_v54 = vld [vmem:[#allocation12_spill] sm:$0xff] }
 0xb32   :  { %v2381_v56 = vpop.f32.mrf.mxu0  ;;  %v2452_v53 = vpop.f32.mrf.mxu1 }
 0xb33   :  { %v2457_v8 = vadd.f32 %v2381_v56, %v2308_v32  ;;  %v2459_v9 = vadd.f32 %v2452_v53, %v2310_v43  ;;  %v5271_v32 = vld [vmem:[#allocation13_spill] sm:$0xff] }
 0xb34   :  { %v2383_v59 = vpop.f32.mrf.mxu0  ;;  %v2454_v52 = vpop.f32.mrf.mxu1 }
 0xb35   :  { %v2840_v21 = vmul.f32 -1.442695, %v2457_v8  ;;  %v2842_v42 = vmul.f32 -1.442695, %v2459_v9  ;;  %v2458_v30 = vadd.f32 %v2383_v59, %v2309_v22  ;;  %v2460_v31 = vadd.f32 %v2454_v52, %v2311_v12 }
 0xb37   :  { %3204 = vpow2.f32 %v2840_v21  ;;  %v2841_v0 = vmul.f32 -1.442695, %v2458_v30  ;;  %v2843_v6 = vmul.f32 -1.442695, %v2460_v31  ;;  %v5273_v21 = vld [vmem:[#allocation14_spill] sm:$0xff] }
 0xb38   :  { %3206 = vpow2.f32 %v2842_v42 }
 0xb39   :  { %3208 = vpow2.f32 %v2841_v0  ;;  %v5274_v0 = vld [vmem:[#allocation18_spill] sm:$0xff] }
 0xb3a   :  { %3210 = vpow2.f32 %v2843_v6 }
 0xb44   :  { %v3205_v19 = vpop.eup %3204 }
 0xb45   :  { %v3207_v16 = vpop.eup %3206  ;;  %v2473_v5 = vadd.f32 1.0, %v3205_v19  ;;  %v5275_v19 = vld [vmem:[#allocation19_spill] sm:$0xff] }
 0xb46   :  { %v3209_v48 = vpop.eup %3208  ;;  %v2475_v55 = vadd.f32 1.0, %v3207_v16 }
 0xb47   :  { %v3211_v37 = vpop.eup %3210  ;;  %3212 = vrcp.f32 %v2473_v5  ;;  %v2474_v47 = vadd.f32 1.0, %v3209_v48 }
 0xb48   :  { %3214 = vrcp.f32 %v2475_v55  ;;  %v2476_v36 = vadd.f32 1.0, %v3211_v37 }
 0xb49   :  { %3216 = vrcp.f32 %v2474_v47 }
 0xb4a   :  { %3218 = vrcp.f32 %v2476_v36  ;;  %v5276_v36 = vld [vmem:[#allocation17_spill] sm:$0xff] }
 0xb54   :  { %v3213_v50 = vpop.eup %3212 }
 0xb55   :  { %v3215_v1 = vpop.eup %3214  ;;  %v4845_v2 = vmul.f32 %v3213_v50, %v2457_v8 }
 0xb56   :  { %v3217_v3 = vpop.eup %3216  ;;  %v4851_v39 = vmul.f32 %v3215_v1, %v2459_v9  ;;  %v5272_v9 = vld [vmem:[#allocation16_spill] sm:$0xff] }
 0xb57   :  { %v4847_v15 = vmul.f32 %v3217_v3, %v2458_v30  ;;  %2601 = vrot.lane.b32.xlu1 %v4845_v2, %s3314_s6  ;;  %v3219_v29 = vpop.eup %3218  ;;  %v5277_v3 = vld [vmem:[#allocation15_spill] sm:$0xff] }
 0xb58   :  { %v4855_v28 = vmul.f32 %v3219_v29, %v2460_v31 }
 0xb59   :  { %2603 = vrot.lane.b32.xlu0 %v4847_v15, %s3314_s6 }
 0xb5b   :  { %2605 = vrot.lane.b32.xlu1 %v4851_v39, %s3314_s6 }
 0xb5d   :  { %2607 = vrot.lane.b32.xlu0 %v4855_v28, %s3314_s6 }
 0xb5f   :  { %2585 = vrot.lane.b32.xlu1 %v4845_v2, %s3315_s7 }
 0xb61   :  { %2587 = vrot.lane.b32.xlu0 %v4847_v15, %s3315_s7 }
 0xb63   :  { %2589 = vrot.lane.b32.xlu1 %v4851_v39, %s3315_s7 }
 0xb65   :  { %2591 = vrot.lane.b32.xlu0 %v4855_v28, %s3315_s7 }
 0xb67   :  { %2569 = vrot.lane.b32.xlu1 %v4845_v2, %s3316_s22 }
 0xb69   :  { %2571 = vrot.lane.b32.xlu0 %v4847_v15, %s3316_s22 }
 0xb6b   :  { %2573 = vrot.lane.b32.xlu1 %v4851_v39, %s3316_s22 }
 0xb6d   :  { %2575 = vrot.lane.b32.xlu0 %v4855_v28, %s3316_s22 }
 0xb6f   :  { %2553 = vrot.lane.b32.xlu1 %v4845_v2, %s3317_s2 }
 0xb71   :  { %2555 = vrot.lane.b32.xlu0 %v4847_v15, %s3317_s2 }
 0xb73   :  { %2557 = vrot.lane.b32.xlu1 %v4851_v39, %s3317_s2 }
 0xb75   :  { %2559 = vrot.lane.b32.xlu0 %v4855_v28, %s3317_s2 }
 0xb77   :  { %2537 = vrot.lane.b32.xlu1 %v4845_v2, %s3318_s23 }
 0xb79   :  { %2539 = vrot.lane.b32.xlu0 %v4847_v15, %s3318_s23 }
 0xb7b   :  { %2541 = vrot.lane.b32.xlu1 %v4851_v39, %s3318_s23 }
 0xb7d   :  { %2543 = vrot.lane.b32.xlu0 %v4855_v28, %s3318_s23 }
 0xb7f   :  { %2521 = vrot.lane.b32.xlu1 %v4845_v2, %s3319_s24 }
 0xb81   :  { %2523 = vrot.lane.b32.xlu0 %v4847_v15, %s3319_s24 }
 0xb83   :  { %2525 = vrot.lane.b32.xlu1 %v4851_v39, %s3319_s24 }
 0xb85   :  { %2527 = vrot.lane.b32.xlu0 %v4855_v28, %s3319_s24 }
 0xb87   :  { %2505 = vrot.lane.b32.xlu1 %v4845_v2, %s3320_s25 }
 0xb89   :  { %2507 = vrot.lane.b32.xlu0 %v4847_v15, %s3320_s25 }
 0xb8b   :  { %2509 = vrot.lane.b32.xlu1 %v4851_v39, %s3320_s25 }
 0xb8d   :  { %2511 = vrot.lane.b32.xlu0 %v4855_v28, %s3320_s25 }
 0xb8f   :  { %2489 = vrot.lane.b32.xlu1 %v4845_v2, %s3321_s3 }
 0xb91   :  { %2491 = vrot.lane.b32.xlu0 %v4847_v15, %s3321_s3 }
 0xb93   :  { %2493 = vrot.lane.b32.xlu1 %v4851_v39, %s3321_s3 }
 0xb95   :  { %2495 = vrot.lane.b32.xlu0 %v4855_v28, %s3321_s3 }
 0xb97   :  { %2621 = vperm.xlu1 %3182, %v2618_v63  }
 0xbc9   :  { %v2602_v4 = vpop.permute.xlu1 %2601 }
 0xbcb   :  { %v2604_v13 = vpop.permute.xlu0 %2603 }
 0xbcc   :  { %v2611_v18 = vsel %vm1222_vm4, %v2602_v4, %v2604_v13 }
 0xbcd   :  { %v2606_v10 = vpop.permute.xlu1 %2605  ;;  %v2613_v26 = vmul.f32 %v2611_v18, %v5265_v23  ;;  %v5280_v23 = vld [vmem:[#allocation23_spill] sm:$0xff] }
 0xbce   :  { %v2610_v11 = vsel %vm1222_vm4, %v2604_v13, %v2606_v10  ;;  %v5278_v13 = vld [vmem:[#allocation20_spill] sm:$0xff] }
 0xbcf   :  { %v2614_v17 = vmul.f32 %v2610_v11, %v5264_v14  ;;  %v2608_v20 = vpop.permute.xlu0 %2607 }
 0xbd0   :  { %v2609_v24 = vsel %vm1222_vm4, %v2606_v10, %v2608_v20  ;;  %v2612_v40 = vsel %vm1222_vm4, %v2608_v20, %v2602_v4  ;;  %v5279_v10 = vld [vmem:[#allocation22_spill] sm:$0xff] }
 0xbd1   :  { %v2615_v38 = vmul.f32 %v2609_v24, %v5266_v58  ;;  %v2616_v44 = vmul.f32 %v2612_v40, %v5267_v41  ;;  %v2586_v45 = vpop.permute.xlu1 %2585  ;;  %2641 = vmatprep.subr.mxu0 %v2614_v17 }
 0xbd2   :  { %2642 = vmatpush1.msra.mxu0 %v2613_v26 }
 0xbd3   :  { %2712 = vmatprep.subr.mxu1 %v2616_v44  ;;  %v2588_v46 = vpop.permute.xlu0 %2587  ;;  %v5282_v44 = vld [vmem:[#allocation25_spill] sm:$0xff] }
 0xbd4   :  { %2713 = vmatpush1.msra.mxu1 %v2615_v38  ;;  %v2595_v27 = vsel %vm1182_vm5, %v2586_v45, %v2588_v46 }
 0xbd5   :  { %v2590_v35 = vpop.permute.xlu1 %2589  ;;  %v2597_v25 = vmul.f32 %v2595_v27, %v5269_v62  ;;  %v5283_v27 = vld [vmem:[#allocation26_spill] sm:$0xff] }
 0xbd6   :  { %v2594_v34 = vsel %vm1182_vm5, %v2588_v46, %v2590_v35 }
 0xbd7   :  { %v2598_v61 = vmul.f32 %v2594_v34, %v5268_v49  ;;  %v2592_v57 = vpop.permute.xlu0 %2591  ;;  %v5284_v34 = vld [vmem:[#allocation27_spill] sm:$0xff] }
 0xbd8   :  { %v2593_v60 = vsel %vm1182_vm5, %v2590_v35, %v2592_v57  ;;  %v2596_v51 = vsel %vm1182_vm5, %v2592_v57, %v2586_v45 }
 0xbd9   :  { %v2599_v33 = vmul.f32 %v2593_v60, %v5270_v54  ;;  %v2600_v43 = vmul.f32 %v2596_v51, %v5271_v32  ;;  %v2570_v56 = vpop.permute.xlu1 %2569  ;;  %2643 = vmatprep.subr.mxu0 %v2598_v61  ;;  %v5285_v51 = vld [vmem:[#allocation28_spill] sm:$0xff] }
 0xbda   :  { %2644 = vmatpush1.msra.mxu0 %v2597_v25 }
 0xbdb   :  { %2714 = vmatprep.subr.mxu1 %v2600_v43  ;;  %v2572_v53 = vpop.permute.xlu0 %2571 }
 0xbdc   :  { %2715 = vmatpush1.msra.mxu1 %v2599_v33  ;;  %v2579_v22 = vsel %vm1142_vm6, %v2570_v56, %v2572_v53  ;;  %v5286_v33 = vld [vmem:[#allocation29_spill] sm:$0xff] }
 0xbdd   :  { %v2574_v12 = vpop.permute.xlu1 %2573  ;;  %v2581_v42 = vmul.f32 %v2579_v22, %v5273_v21 }
 0xbde   :  { %v2578_v8 = vsel %vm1142_vm6, %v2572_v53, %v2574_v12 }
 0xbdf   :  { %v2582_v59 = vmul.f32 %v2578_v8, %v5272_v9  ;;  %v2576_v52 = vpop.permute.xlu0 %2575  ;;  %v5288_v8 = vld [vmem:[#allocation31_spill] sm:$0xff] }
 0xbe0   :  { %v2577_v30 = vsel %vm1142_vm6, %v2574_v12, %v2576_v52  ;;  %v2580_v31 = vsel %vm1142_vm6, %v2576_v52, %v2570_v56  ;;  %v5287_v56 = vld [vmem:[#allocation30_spill] sm:$0xff] }
 0xbe1   :  { %v2583_v6 = vmul.f32 %v2577_v30, %v5274_v0  ;;  %v2584_v16 = vmul.f32 %v2580_v31, %v5275_v19  ;;  %v2554_v5 = vpop.permute.xlu1 %2553  ;;  %2645 = vmatprep.subr.mxu0 %v2582_v59  ;;  %v5289_v31 = vld [vmem:[#allocation32_spill] sm:$0xff] }
 0xbe2   :  { %2646 = vmatpush1.msra.mxu0 %v2581_v42 }
 0xbe3   :  { %2716 = vmatprep.subr.mxu1 %v2584_v16  ;;  %v2556_v48 = vpop.permute.xlu0 %2555 }
 0xbe4   :  { %2717 = vmatpush1.msra.mxu1 %v2583_v6  ;;  %v2563_v55 = vsel %vm1102_vm7, %v2554_v5, %v2556_v48  ;;  %v5290_v6 = vld [vmem:[#allocation33_spill] sm:$0xff] }
 0xbe5   :  { %v2558_v37 = vpop.permute.xlu1 %2557  ;;  %v2565_v29 = vmul.f32 %v2563_v55, %v5277_v3 }
 0xbe6   :  { %v2562_v47 = vsel %vm1102_vm7, %v2556_v48, %v2558_v37 }
 0xbe7   :  { %v2566_v50 = vmul.f32 %v2562_v47, %v5276_v36  ;;  %v2560_v1 = vpop.permute.xlu0 %2559  ;;  %v5292_v47 = vld [vmem:[#allocation35_spill] sm:$0xff] }
 0xbe8   :  { %v2561_v63 = vsel %vm1102_vm7, %v2558_v37, %v2560_v1  ;;  %v2564_v4 = vsel %vm1102_vm7, %v2560_v1, %v2554_v5  ;;  %v5291_v5 = vld [vmem:[#allocation34_spill] sm:$0xff] }
 0xbe9   :  { %v2567_v18 = vmul.f32 %v2561_v63, %v5278_v13  ;;  %v2568_v11 = vmul.f32 %v2564_v4, %v5279_v10  ;;  %v2538_v14 = vpop.permute.xlu1 %2537  ;;  %2647 = vmatprep.subr.mxu0 %v2566_v50  ;;  %v5293_v4 = vld [vmem:[#allocation36_spill] sm:$0xff] }
 0xbea   :  { %2648 = vmatpush1.msra.mxu0 %v2565_v29 }
 0xbeb   :  { %2649 = vmatprep.subr.mxu0 %v4847_v15  ;;  %2718 = vmatprep.subr.mxu1 %v2568_v11  ;;  %v2540_v17 = vpop.permute.xlu0 %2539  ;;  %v2617_v11 = vld [vmem:[%s5057_s17] sm:$0xff]  ;;  %s3322_s17 = smov [#allocation2]  }
 0xbec   :  { %v2547_v20 = vsel %vm1062_vm8, %v2538_v14, %v2540_v17  ;;  %2650 = vmatpush1.msra.mxu0 %v4845_v2  ;;  %2719 = vmatpush1.msra.mxu1 %v2567_v18  ;;  %v5281_v2 = vld [vmem:[#allocation24_spill] sm:$0xff]  ;;  %v5294_v18 = vld [vmem:[#allocation37_spill] sm:$0xff]  ;;  %s2783_s23 = sshll.u32 %s3322_s17, 4  ;;  %s2784_s23 = int_to_ptr.vmem [resolvable:$true] %s2783_s23 }
 0xbed   :  { %v2550_v26 = vmul.f32 %v2547_v20, %v5280_v23  ;;  %v2542_v24 = vpop.permute.xlu1 %2541  ;;  %2720 = vmatprep.subr.mxu1 %v4855_v28  ;;  %s3288_s29 = scalar_lea.vmem %s2784_s23, 512  ;;  %p3293_p1 = scmp.lt.s32.totalorder %s2784_s23, %s2784_s23 }
 0xbee   :  { %2721 = vmatpush1.msra.mxu1 %v4851_v39  ;;  %v2546_v40 = vsel %vm1062_vm8, %v2540_v17, %v2542_v24  ;;  %p3289_p0 = scmp.ne.s32.totalorder %s2784_s23, %s3288_s29  ;;  %p3294_p2 = scmp.lt.s32.totalorder %s3288_s29, %s3288_s29 }
 0xbef   :  { %2651 = vmatprep.subr.mxu0 %v2550_v26  ;;  %v2544_v15 = vpop.permute.xlu0 %2543  ;;  %v2551_v28 = vmul.f32 %v2546_v40, %v5283_v27 }
 0xbf0   :  { %v2545_v58 = vsel %vm1062_vm8, %v2542_v24, %v2544_v15  ;;  %v2548_v38 = vsel %vm1062_vm8, %v2544_v15, %v2538_v14  ;;  %v5295_v14 = vld [vmem:[#allocation38_spill] sm:$0xff]  ;;  %v3284_v15 = vld [vmem:[%s5156_s21] sm:$0xff]  ;;  %p3295_p3 = por %p3294_p2, %p3293_p1 }
 0xbf1   :  { %v2549_v41 = vmul.f32 %v2548_v38, %v5281_v2  ;;  %v2552_v45 = vmul.f32 %v2545_v58, %v5282_v44  ;;  %v2522_v46 = vpop.permute.xlu1 %2521 }
 0xbf2   :  { %p3296_p4 = pnand %p3295_p3, %p3289_p0 }
 0xbf3   :  { %2652 = vmatpush1.msra.mxu0 %v2549_v41  ;;  %2722 = vmatprep.subr.mxu1 %v2552_v45  ;;  %v2524_v39 = vpop.permute.xlu0 %2523  ;;  %v3285_v41 = vld [vmem:[%s5156_s21 + $0x10] sm:$0xff] }
 0xbf4   :  { %v2531_v35 = vsel %vm1022_vm9, %v2522_v46, %v2524_v39  ;;  %2723 = vmatpush1.msra.mxu1 %v2551_v28  ;;  %v3287_v28 = vld [vmem:[%s5156_s21 + $0x18] sm:$0xff] }
 0xbf5   :  { %v2534_v49 = vmul.f32 %v2531_v35, %v5284_v34  ;;  %v2526_v61 = vpop.permute.xlu1 %2525 }
 0xbf6   :  { %v2530_v57 = vsel %vm1022_vm9, %v2524_v39, %v2526_v61 }
 0xbf7   :  { %2653 = vmatprep.subr.mxu0 %v2534_v49  ;;  %v2528_v62 = vpop.permute.xlu0 %2527  ;;  %v2535_v53 = vmul.f32 %v2530_v57, %v5287_v56 }
 0xbf8   :  { %v2529_v25 = vsel %vm1022_vm9, %v2526_v61, %v2528_v62  ;;  %v2532_v60 = vsel %vm1022_vm9, %v2528_v62, %v2522_v46  ;;  %v3286_v46 = vld [vmem:[%s5156_s21 + $0x8] sm:$0xff] }
 0xbf9   :  { %v2533_v54 = vmul.f32 %v2532_v60, %v5285_v51  ;;  %v2536_v32 = vmul.f32 %v2529_v25, %v5286_v33  ;;  %v2506_v43 = vpop.permute.xlu1 %2505 }
 0xbfb   :  { %2654 = vmatpush1.msra.mxu0 %v2533_v54  ;;  %2724 = vmatprep.subr.mxu1 %v2536_v32  ;;  %v2508_v22 = vpop.permute.xlu0 %2507 }
 0xbfc   :  { %v2515_v12 = vsel %vm982_vm10, %v2506_v43, %v2508_v22  ;;  %2725 = vmatpush1.msra.mxu1 %v2535_v53 }
 0xbfd   :  { %v2518_v9 = vmul.f32 %v2515_v12, %v5288_v8  ;;  %v2510_v59 = vpop.permute.xlu1 %2509 }
 0xbfe   :  { %v2514_v52 = vsel %vm982_vm10, %v2508_v22, %v2510_v59 }
 0xbff   :  { %2655 = vmatprep.subr.mxu0 %v2518_v9  ;;  %v2512_v21 = vpop.permute.xlu0 %2511  ;;  %v2519_v48 = vmul.f32 %v2514_v52, %v5291_v5 }
 0xc00   :  { %v2513_v42 = vsel %vm982_vm10, %v2510_v59, %v2512_v21  ;;  %v2516_v30 = vsel %vm982_vm10, %v2512_v21, %v2506_v43 }
 0xc01   :  { %v2517_v0 = vmul.f32 %v2516_v30, %v5289_v31  ;;  %v2520_v19 = vmul.f32 %v2513_v42, %v5290_v6  ;;  %v2490_v16 = vpop.permute.xlu1 %2489 }
 0xc03   :  { %2656 = vmatpush1.msra.mxu0 %v2517_v0  ;;  %2726 = vmatprep.subr.mxu1 %v2520_v19  ;;  %v2492_v55 = vpop.permute.xlu0 %2491 }
 0xc04   :  { %v2499_v37 = vsel %vm943_vm11, %v2490_v16, %v2492_v55  ;;  %2727 = vmatpush1.msra.mxu1 %v2519_v48 }
 0xc05   :  { %v2502_v36 = vmul.f32 %v2499_v37, %v5292_v47  ;;  %v2494_v50 = vpop.permute.xlu1 %2493 }
 0xc06   :  { %v2498_v1 = vsel %vm943_vm11, %v2492_v55, %v2494_v50 }
 0xc07   :  { %2657 = vmatprep.subr.mxu0 %v2502_v36  ;;  %v2496_v3 = vpop.permute.xlu0 %2495  ;;  %v2503_v17 = vmul.f32 %v2498_v1, %v5295_v14 }
 0xc08   :  { %v2497_v29 = vsel %vm943_vm11, %v2494_v50, %v2496_v3  ;;  %v2500_v63 = vsel %vm943_vm11, %v2496_v3, %v2490_v16 }
 0xc09   :  { %v2501_v13 = vmul.f32 %v2500_v63, %v5293_v4  ;;  %v2504_v10 = vmul.f32 %v2497_v29, %v5294_v18 }
 0xc0b   :  { %2658 = vmatpush1.msra.mxu0 %v2501_v13  ;;  %2728 = vmatprep.subr.mxu1 %v2504_v10 }
 0xc0c   :  { %2844 = vmatmul.mubr.msk.f32.vlgmr.msra.gmra.mxu0 %vm1261_vm12, %v2617_v11  ;;  %2729 = vmatpush1.msra.mxu1 %v2503_v17 }
 0xc0d   :  { %2845 = vmatmul.mubr.msk.f32.vlgmr.msra.gmra.mxu1 %vm1261_vm12, %v2617_v11 }
 0xc12   :  { %v2622_v20 = vpop.permute.xlu1 %2621 }
 0xccc   :  { %v2693_v7 = vpop.f32.mrf.mxu0 }
 0xccd   :  { %v2694_v23 = vadd.f32 %v2693_v7, %v2622_v20  ;;  %v2764_v26 = vpop.f32.mrf.mxu1 }
 0xcce   :  { %v2765_v24 = vadd.f32 %v2764_v26, %v2622_v20  ;;  %v2695_v40 = vpop.f32.mrf.mxu0 }
 0xccf   :  { %v2769_v58 = vadd.f32 %v3284_v15, %v2694_v23  ;;  %v2696_v38 = vadd.f32 %v2695_v40, %v2622_v20  ;;  %v2766_v2 = vpop.f32.mrf.mxu1 }
 0xcd0   :  { %v2771_v44 = vadd.f32 %v3285_v41, %v2765_v24  ;;  %v2767_v45 = vadd.f32 %v2766_v2, %v2622_v20 }
 0xcd1   :  { %2773 = vst [vmem:[#allocation2] sm:$0xff] %v2769_v58  ;;  %v2770_v27 = vadd.f32 %v3286_v46, %v2696_v38 }
 0xcd2   :  { %2775 = vst [vmem:[#allocation2 + $0x10] sm:$0xff] %v2771_v44  ;;  %v2772_v39 = vadd.f32 %v3287_v28, %v2767_v45 }
 0xcd3   :  { %2774 = vst [vmem:[#allocation2 + $0x8] sm:$0xff] %v2770_v27 }
 0xcd4   :  { %2776 = vst [vmem:[#allocation2 + $0x18] sm:$0xff] %v2772_v39 }
 0xcd5   :  { %3299 = shalt.err (!%p3296_p4)
}
 0xcd6   :  { %2786 = dma.vmem_to_hbm [thread:$0]  %s2784_s23, 512, %s5059_s19, [#allocation3]  }
 0xcd7   :  { %3308 = dma.done.wait [#allocation3], 512  }
 0xcd8   :  { %3309 = vsyncadd [#allocation3], 4294966784 }
 0xcd9   :  { %2790 = vsyncpa [#allocation3], 1 }

</bundles_post_ra>
